<compile_context>
chip_gen: v7x
topology: tpu7x:2x2x1
jax: 0.10.0
libtpu: 0.0.40
codegen_flags: <defaults>
</compile_context>

<pallas_src>
import numpy as np
import jax
import jax.numpy as jnp
from jax.experimental import pallas as pl
from jax.experimental.pallas import tpu as pltpu

LANE = 128
SUBLANE = 8


def _round_up(x, m):
    return ((x + m - 1) // m) * m


def _vmem_capacity_bytes():
    try:
        info = pltpu.get_tpu_info()
        cap = getattr(info, "vmem_capacity_bytes", None)
        if cap:
            return int(cap)
    except Exception:
        pass
    return 64 * 1024 * 1024          # conservative fallback (v7x-sized)


# --------------------------------------------------------------------------- #
# Kernel
# --------------------------------------------------------------------------- #
def _customclip_kernel(p_ref,
                       x_ref, ew_ref, eb_ref, dw_ref, db_ref, bnd_ref, vw_ref,
                       txt_ref,
                       out_ref, h_acc, h_bf, f_acc):
    """One (batch-tile, phase-step) grid point of the fused forward."""
    s = pl.program_id(1)
    n_s = pl.num_programs(1)
    kd = n_s // 2                      # number of D tiles per phase

    @pl.when(s == 0)
    def _init():
        h_acc[...] = jnp.zeros_like(h_acc)
        f_acc[...] = jnp.zeros_like(f_acc)

    # ---- phase 1: coordinator encoder, accumulate over D tiles --------------
    @pl.when(s < kd)
    def _phase1():
        h_acc[...] += jnp.dot(x_ref[...], ew_ref[...],
                              preferred_element_type=jnp.float32)

    # ---- transition: bias + activation, applied exactly once -----------------
    @pl.when(s == kd)
    def _activate():
        # TODO(synk): torch.nn.GELU defaults to the exact erf form; tanh approx
        # is used for the synthetic coordinator stand-in.
        h_bf[...] = jax.nn.gelu(h_acc[...] + eb_ref[...],
                                approximate=True).astype(jnp.bfloat16)

    # ---- phase 2: prompt tile -> clip_clipping -> visual-feature accumulation
    @pl.when(s >= kd)
    def _phase2():
        x = x_ref[...].astype(jnp.float32)                     # bf16 stream -> f32
        prompt = jnp.dot(h_bf[...], dw_ref[...],
                         preferred_element_type=jnp.float32) + db_ref[...]
        prompt = jnp.tanh(prompt)
        prompted = jnp.clip(x + p_ref[0] * prompt,
                            bnd_ref[0:1, :], bnd_ref[1:2, :])  # per-feature bounds
        f_acc[...] += jnp.dot(prompted.astype(jnp.bfloat16), vw_ref[...],
                              preferred_element_type=jnp.float32)

    # ---- finalize: L2 normalize + pre-scaled text-feature matmul -------------
    @pl.when(s == n_s - 1)
    def _finalize():
        feat = f_acc[...]
        inv = jax.lax.rsqrt(jnp.sum(feat * feat, axis=-1, keepdims=True) + 1e-12)
        feat = (feat * inv).astype(jnp.bfloat16)
        # logit_scale.exp() is pre-folded into txt_ref in the wrapper.
        out_ref[...] = jnp.dot(feat, txt_ref[...],
                               preferred_element_type=jnp.float32)


# --------------------------------------------------------------------------- #
# Operand preparation
# --------------------------------------------------------------------------- #
def _prepare(image, params, tile_b, tile_d):
    """Pad/cast every operand into TPU-friendly shapes (lane dims -> 128,
    batch -> multiple of the batch tile, D -> multiple of tile_d, bf16 streams)."""
    B, C, H, W = image.shape
    D = C * H * W
    hw = H * W

    hidden = params["enc_w"].shape[1]
    feat_dim = params["vis_w"].shape[1]
    n_classes = params["txt"].shape[0]

    vmem_cap = _vmem_capacity_bytes()
    vmem_limit = int(vmem_cap * 3 // 4)

    if tile_d is None:
        # v5e/v6e (128 MiB VMEM): 4096-wide D tiles; v7x (64 MiB): 2048.
        td_cap = 4096 if vmem_cap >= 100 * 1024 * 1024 else 2048
        tile_d = min(td_cap, _round_up(min(D, td_cap), LANE))
    d_pad = _round_up(D, tile_d)

    b_pad = _round_up(B, SUBLANE)
    if tile_b is None:
        tile_b = min(256, b_pad)
        # Prefer >=2 batch tiles so the "parallel" axis shards across both
        # TensorCores on v7x (near-free 2x when compute-bound).
        if b_pad > SUBLANE and b_pad // tile_b < 2:
            tile_b = max(SUBLANE, _round_up((b_pad + 1) // 2, SUBLANE))
    b_pad = _round_up(b_pad, tile_b)

    h_pad = _round_up(hidden, LANE)
    f_pad = _round_up(feat_dim, LANE)
    n_pad = _round_up(n_classes, LANE)

    f32, bf16 = jnp.float32, jnp.bfloat16

    def pad2(a, r, c, dtype):
        a = a.astype(f32)
        return jnp.pad(a, ((0, r - a.shape[0]), (0, c - a.shape[1]))).astype(dtype)

    # Activation stream in bf16 (halves the double-read HBM traffic).
    x = jnp.pad(image.reshape(B, D).astype(f32),
                ((0, b_pad - B), (0, d_pad - D))).astype(bf16)

    enc_w = pad2(params["enc_w"], d_pad, h_pad, bf16)
    enc_b = pad2(params["enc_b"].reshape(1, -1), 1, h_pad, f32)
    dec_w = pad2(params["dec_w"], h_pad, d_pad, bf16)
    dec_b = pad2(params["dec_b"].reshape(1, -1), 1, d_pad, f32)
    vis_w = pad2(params["vis_w"], d_pad, f_pad, bf16)

    # Per-feature clip bounds precomputed host-side: row 0 = lo, row 1 = hi.
    # Padded tail uses lo = hi = 0 so padded features clamp to exactly 0.
    ch = jnp.arange(D, dtype=jnp.int32) // hw
    bounds = jnp.stack([params["lo_c"].astype(f32)[ch],
                        params["hi_c"].astype(f32)[ch]], axis=0)
    bounds = jnp.pad(bounds, ((0, 0), (0, d_pad - D)))

    # Fold logit_scale.exp() into the (pre-normalized) text features.
    logit_scale = jnp.exp(params["logit_scale"].astype(f32))
    txt_t = pad2((params["txt"].astype(f32) * logit_scale).T, f_pad, n_pad, bf16)

    ops = dict(
        p_eps=jnp.asarray(params["p_eps"], f32).reshape(1),
        x=x, enc_w=enc_w, enc_b=enc_b, dec_w=dec_w, dec_b=dec_b,
        bounds=bounds, vis_w=vis_w, txt_t=txt_t)
    dims = dict(B=B, C=C, hw=hw, D=D, n_classes=n_classes,
                b_pad=b_pad, d_pad=d_pad, h_pad=h_pad, f_pad=f_pad, n_pad=n_pad,
                tile_b=tile_b, tile_d=tile_d, vmem_limit=vmem_limit)
    return ops, dims


# --------------------------------------------------------------------------- #
# pallas_call wrapper
# --------------------------------------------------------------------------- #
def customclip_forward(image, params, *, tile_b=None, tile_d=None):
    """image: [B, C, H, W] float32 (NCHW).  Returns logits [B, n_classes]."""
    ops, dm = _prepare(image, params, tile_b, tile_d)
    tb, td = dm["tile_b"], dm["tile_d"]
    b_pad, d_pad = dm["b_pad"], dm["d_pad"]
    h_pad, f_pad, n_pad = dm["h_pad"], dm["f_pad"], dm["n_pad"]
    kd = d_pad // td
    grid = (b_pad // tb, 2 * kd)   # (batch tiles [parallel], phase steps [arbitrary])
    n_bt = b_pad // tb

    def make_specs(single_buffer_consts):
        def const_spec(shape):
            # Block index never changes -> one buffer is enough (VMEM saving).
            if single_buffer_consts:
                return pl.BlockSpec(shape, lambda b, s: (0, 0),
                                    pipeline_mode=pl.Buffered(1))
            return pl.BlockSpec(shape, lambda b, s: (0, 0))

        smem = pl.BlockSpec(memory_space=pltpu.MemorySpace.SMEM)
        in_specs = [
            smem,                                                                 # p_eps
            pl.BlockSpec((tb, td), lambda b, s: (b, s % kd)),                     # x (both phases)
            pl.BlockSpec((td, h_pad), lambda b, s: (jnp.minimum(s, kd - 1), 0)),  # enc_w (phase 1)
            const_spec((1, h_pad)),                                               # enc_b
            pl.BlockSpec((h_pad, td), lambda b, s: (0, jnp.maximum(s - kd, 0))),  # dec_w (phase 2)
            pl.BlockSpec((1, td), lambda b, s: (0, jnp.maximum(s - kd, 0))),      # dec_b (phase 2)
            pl.BlockSpec((2, td), lambda b, s: (0, jnp.maximum(s - kd, 0))),      # clip bounds
            pl.BlockSpec((td, f_pad), lambda b, s: (jnp.maximum(s - kd, 0), 0)),  # vis_w (phase 2)
            const_spec((f_pad, n_pad)),                                           # txt_t (finalize)
        ]
        out_spec = pl.BlockSpec((tb, n_pad), lambda b, s: (b, 0))                 # lane-dense output
        return in_specs, out_spec

    # Cost hint: weights re-streamed once per batch tile.
    flops = 2 * b_pad * d_pad * (2 * h_pad + f_pad) + 2 * b_pad * f_pad * n_pad
    bytes_accessed = (2 * ops["x"].size * 2
                      + n_bt * (ops["enc_w"].size + ops["dec_w"].size
                                + ops["vis_w"].size + ops["txt_t"].size) * 2
                      + n_bt * (ops["enc_b"].size + ops["dec_b"].size
                                + ops["bounds"].size) * 4
                      + b_pad * n_pad * 4)
    transcendentals = b_pad * (h_pad + d_pad)                   # gelu + tanh

    def build(single_buffer_consts):
        in_specs, out_spec = make_specs(single_buffer_consts)
        return pl.pallas_call(
            _customclip_kernel,
            out_shape=jax.ShapeDtypeStruct((b_pad, n_pad), jnp.float32),
            grid=grid,
            in_specs=in_specs,
            out_specs=out_spec,
            scratch_shapes=[pltpu.VMEM((tb, h_pad), jnp.float32),    # coordinator hidden (f32 acc)
                            pltpu.VMEM((tb, h_pad), jnp.bfloat16),   # hidden, cast once for phase 2
                            pltpu.VMEM((tb, f_pad), jnp.float32)],   # image features
            compiler_params=pltpu.CompilerParams(
                dimension_semantics=("parallel", "arbitrary"),
                vmem_limit_bytes=dm["vmem_limit"]),
            cost_estimate=pl.CostEstimate(flops=flops,
                                          transcendentals=transcendentals,
                                          bytes_accessed=bytes_accessed),
        )

    args = (ops["p_eps"], ops["x"], ops["enc_w"], ops["enc_b"], ops["dec_w"],
            ops["dec_b"], ops["bounds"], ops["vis_w"], ops["txt_t"])

    try:
        logits = jax.block_until_ready(build(True)(*args))
    except Exception:
        # pl.Buffered(1) not supported in this runtime -> default double-buffering.
        logits = jax.block_until_ready(build(False)(*args))

    return logits[:dm["B"], :dm["n_classes"]]


# --------------------------------------------------------------------------- #
# Pure-JAX reference (identical padded/cast operands)
# --------------------------------------------------------------------------- #
def customclip_reference(image, params, *, tile_b=None, tile_d=None):
    ops, dm = _prepare(image, params, tile_b, tile_d)
    f32, bf16 = jnp.float32, jnp.bfloat16
    x_bf = ops["x"]
    x = x_bf.astype(f32)
    h = jnp.dot(x_bf, ops["enc_w"], preferred_element_type=f32) + ops["enc_b"]
    h = jax.nn.gelu(h, approximate=True)
    prompt = jnp.tanh(jnp.dot(h.astype(bf16), ops["dec_w"],
                              preferred_element_type=f32) + ops["dec_b"])
    prompted = jnp.clip(x + ops["p_eps"][0] * prompt,
                        ops["bounds"][0:1, :], ops["bounds"][1:2, :])
    feat = jnp.dot(prompted.astype(bf16), ops["vis_w"], preferred_element_type=f32)
    feat = feat * jax.lax.rsqrt(jnp.sum(feat * feat, axis=-1, keepdims=True) + 1e-12)
    logits = jnp.dot(feat.astype(bf16), ops["txt_t"], preferred_element_type=f32)
    return logits[:dm["B"], :dm["n_classes"]]


# --------------------------------------------------------------------------- #
# Synthetic parameters
# --------------------------------------------------------------------------- #
def make_params(key, C, H, W, hidden, feat_dim, n_classes, p_eps=1.0):
    """Deterministic synthetic parameters matching the module's structure."""
    D = C * H * W
    ks = jax.random.split(key, 4)

    enc_w = 0.02 * jax.random.normal(ks[0], (D, hidden), jnp.float32)
    enc_b = jnp.zeros((hidden,), jnp.float32)
    dec_w = 0.02 * jax.random.normal(ks[1], (hidden, D), jnp.float32)
    dec_b = jnp.zeros((D,), jnp.float32)
    vis_w = 0.05 * jax.random.normal(ks[2], (D, feat_dim), jnp.float32)

    # text_features = encode_text(prompts), pre-normalized along the last dim.
    txt = jax.random.normal(ks[3], (n_classes, feat_dim), jnp.float32)
    txt = txt / jnp.linalg.norm(txt, axis=-1, keepdims=True)

    # clip_clipping bounds: valid CLIP-normalized pixel range per channel.
    clip_mean = np.array([0.48145466, 0.4578275, 0.40821073], np.float32)
    clip_std = np.array([0.26862954, 0.26130258, 0.27577711], np.float32)
    mean_c = clip_mean[np.arange(C) % 3]
    std_c = clip_std[np.arange(C) % 3]
    lo_c = jnp.asarray(-mean_c / std_c, jnp.float32)
    hi_c = jnp.asarray((1.0 - mean_c) / std_c, jnp.float32)

    return dict(enc_w=enc_w, enc_b=enc_b, dec_w=dec_w, dec_b=dec_b,
                vis_w=vis_w, txt=txt,
                logit_scale=jnp.asarray(np.log(1.0 / 0.07), jnp.float32),  # CLIP init
                p_eps=jnp.asarray(p_eps, jnp.float32),
                lo_c=lo_c, hi_c=hi_c)


if __name__ == "__main__":
    # Small shapes consistent with the forward: batch=2, channels=4,
    # spatial=16x16, coordinator hidden=32, feature dim=32, n_classes=8.
    B, C, H, W = 2, 4, 16, 16
    hidden, feat_dim, n_classes = 32, 32, 8

    key = jax.random.PRNGKey(0)
    k_img, k_par = jax.random.split(key)
    image = jax.random.normal(k_img, (B, C, H, W), jnp.float32)   # NCHW
    params = make_params(k_par, C, H, W, hidden, feat_dim, n_classes)

    # tile_d=256 -> 4 D-tiles per phase even at toy shapes, so both reduction
    # phases and the weight streaming are exercised.
    logits = customclip_forward(image, params, tile_d=256)
    jax.block_until_ready(logits)

    ref = customclip_reference(image, params, tile_d=256)
    assert logits.shape == (B, n_classes)
    assert bool(jnp.all(jnp.isfinite(logits)))
    assert bool(jnp.allclose(logits, ref, rtol=2e-2, atol=5e-2)), \
        float(jnp.max(jnp.abs(logits - ref)))
    print("KERNEL_OK")
</pallas_src>

<mosaic_0001>
module attributes {stable_mosaic.version = 11 : i64} {
  func.func @_customclip_kernel(%arg0: i32, %arg1: i32, %arg2: memref<1xf32, #tpu.memory_space<smem>>, %arg3: memref<8x256xbf16, #tpu.memory_space<vmem>>, %arg4: memref<256x128xbf16, #tpu.memory_space<vmem>>, %arg5: memref<1x128xf32, #tpu.memory_space<vmem>>, %arg6: memref<128x256xbf16, #tpu.memory_space<vmem>>, %arg7: memref<1x256xf32, #tpu.memory_space<vmem>>, %arg8: memref<2x256xf32, #tpu.memory_space<vmem>>, %arg9: memref<256x128xbf16, #tpu.memory_space<vmem>>, %arg10: memref<128x128xbf16, #tpu.memory_space<vmem>>, %arg11: memref<8x128xf32, #tpu.memory_space<vmem>>, %arg12: memref<8x128xf32, #tpu.memory_space<vmem>>, %arg13: memref<8x128xbf16, #tpu.memory_space<vmem>>, %arg14: memref<8x128xf32, #tpu.memory_space<vmem>>) attributes {dimension_semantics = [#tpu.dimension_semantics<parallel>, #tpu.dimension_semantics<arbitrary>], iteration_bounds = array<i64: 1, 8>, scalar_prefetch = 0 : i64, scratch_operands = 3 : i64, tpu.core_type = #tpu.core_type<tc>, window_params = [{transform_indices = @transform_0, window_bounds = array<i64: 1>}, {transform_indices = @transform_1, window_bounds = array<i64: 8, 256>}, {transform_indices = @transform_2, window_bounds = array<i64: 256, 128>}, {pipeline_mode = #tpu.pipeline_mode<synchronous>, transform_indices = @transform_3, window_bounds = array<i64: 1, 128>}, {transform_indices = @transform_4, window_bounds = array<i64: 128, 256>}, {transform_indices = @transform_5, window_bounds = array<i64: 1, 256>}, {transform_indices = @transform_6, window_bounds = array<i64: 2, 256>}, {transform_indices = @transform_7, window_bounds = array<i64: 256, 128>}, {pipeline_mode = #tpu.pipeline_mode<synchronous>, transform_indices = @transform_8, window_bounds = array<i64: 128, 128>}, {transform_indices = @transform_9, window_bounds = array<i64: 8, 128>}]} {
    %c0_i32 = arith.constant 0 : i32
    %0 = arith.cmpi eq, %arg1, %c0_i32 : i32
    %1 = arith.extui %0 : i1 to i32
    %c0_i32_0 = arith.constant 0 : i32
    %2 = arith.cmpi ne, %1, %c0_i32_0 : i32
    scf.if %2 {
      %cst = arith.constant 0.000000e+00 : f32
      %15 = vector.broadcast %cst : f32 to vector<8x128xf32>
      %c0 = arith.constant 0 : index
      %c0_7 = arith.constant 0 : index
      %16 = vector.load %arg12[%c0, %c0_7] : memref<8x128xf32, #tpu.memory_space<vmem>>, vector<8x128xf32>
      tpu.vector_store %arg12[%c0, %c0_7], %15 {strides = array<i32>} : memref<8x128xf32, #tpu.memory_space<vmem>>, vector<8x128xf32>,
      %cst_8 = arith.constant 0.000000e+00 : f32
      %17 = vector.broadcast %cst_8 : f32 to vector<8x128xf32>
      %c0_9 = arith.constant 0 : index
      %c0_10 = arith.constant 0 : index
      %18 = vector.load %arg14[%c0_9, %c0_10] : memref<8x128xf32, #tpu.memory_space<vmem>>, vector<8x128xf32>
      tpu.vector_store %arg14[%c0_9, %c0_10], %17 {strides = array<i32>} : memref<8x128xf32, #tpu.memory_space<vmem>>, vector<8x128xf32>,
    } else {
    }
    %c4_i32 = arith.constant 4 : i32
    %3 = arith.cmpi slt, %arg1, %c4_i32 : i32
    %4 = arith.extui %3 : i1 to i32
    %c0_i32_1 = arith.constant 0 : i32
    %5 = arith.cmpi ne, %4, %c0_i32_1 : i32
    scf.if %5 {
      %c0 = arith.constant 0 : index
      %c0_7 = arith.constant 0 : index
      %15 = vector.load %arg12[%c0, %c0_7] : memref<8x128xf32, #tpu.memory_space<vmem>>, vector<8x128xf32>
      %c0_8 = arith.constant 0 : index
      %c0_9 = arith.constant 0 : index
      %16 = vector.load %arg3[%c0_8, %c0_9] : memref<8x256xbf16, #tpu.memory_space<vmem>>, vector<8x256xbf16>
      %c0_10 = arith.constant 0 : index
      %c0_11 = arith.constant 0 : index
      %17 = vector.load %arg4[%c0_10, %c0_11] : memref<256x128xbf16, #tpu.memory_space<vmem>>, vector<256x128xbf16>
      %cst = arith.constant dense<0.000000e+00> : vector<8x128xf32>
      %18 = tpu.matmul %16, %17, %cst {dimension_numbers = #tpu.dot_dimension_numbers<[1], [0], [0], [1], [0, 0, 1, 1], [], []>} : vector<8x256xbf16>, vector<256x128xbf16>, vector<8x128xf32> -> vector<8x128xf32>
      %19 = arith.addf %15, %18 : vector<8x128xf32>
      %c0_12 = arith.constant 0 : index
      %c0_13 = arith.constant 0 : index
      %20 = vector.load %arg12[%c0_12, %c0_13] : memref<8x128xf32, #tpu.memory_space<vmem>>, vector<8x128xf32>
      tpu.vector_store %arg12[%c0_12, %c0_13], %19 {strides = array<i32>} : memref<8x128xf32, #tpu.memory_space<vmem>>, vector<8x128xf32>,
    } else {
    }
    %c4_i32_2 = arith.constant 4 : i32
    %6 = arith.cmpi eq, %arg1, %c4_i32_2 : i32
    %7 = arith.extui %6 : i1 to i32
    %c0_i32_3 = arith.constant 0 : i32
    %8 = arith.cmpi ne, %7, %c0_i32_3 : i32
    scf.if %8 {
      %c0 = arith.constant 0 : index
      %c0_7 = arith.constant 0 : index
      %15 = vector.load %arg12[%c0, %c0_7] : memref<8x128xf32, #tpu.memory_space<vmem>>, vector<8x128xf32>
      %c0_8 = arith.constant 0 : index
      %c0_9 = arith.constant 0 : index
      %16 = vector.load %arg5[%c0_8, %c0_9] : memref<1x128xf32, #tpu.memory_space<vmem>>, vector<1x128xf32>
      %17 = vector.broadcast %16 : vector<1x128xf32> to vector<8x128xf32>
      %18 = arith.addf %15, %17 : vector<8x128xf32>
      %19 = arith.mulf %18, %18 : vector<8x128xf32>
      %20 = arith.mulf %18, %19 : vector<8x128xf32>
      %cst = arith.constant 4.471500e-02 : f32
      %21 = vector.broadcast %cst : f32 to vector<8x128xf32>
      %22 = arith.mulf %21, %20 : vector<8x128xf32>
      %23 = arith.addf %18, %22 : vector<8x128xf32>
      %cst_10 = arith.constant 0.797884583 : f32
      %24 = vector.broadcast %cst_10 : f32 to vector<8x128xf32>
      %25 = arith.mulf %24, %23 : vector<8x128xf32>
      %26 = math.tanh %25 : vector<8x128xf32>
      %cst_11 = arith.constant 1.000000e+00 : f32
      %27 = vector.broadcast %cst_11 : f32 to vector<8x128xf32>
      %28 = arith.addf %27, %26 : vector<8x128xf32>
      %cst_12 = arith.constant 5.000000e-01 : f32
      %29 = vector.broadcast %cst_12 : f32 to vector<8x128xf32>
      %30 = arith.mulf %29, %28 : vector<8x128xf32>
      %31 = arith.mulf %18, %30 : vector<8x128xf32>
      %32 = arith.truncf %31 : vector<8x128xf32> to vector<8x128xbf16>
      %c0_13 = arith.constant 0 : index
      %c0_14 = arith.constant 0 : index
      %33 = vector.load %arg13[%c0_13, %c0_14] : memref<8x128xbf16, #tpu.memory_space<vmem>>, vector<8x128xbf16>
      tpu.vector_store %arg13[%c0_13, %c0_14], %32 {strides = array<i32>} : memref<8x128xbf16, #tpu.memory_space<vmem>>, vector<8x128xbf16>,
    } else {
    }
    %c4_i32_4 = arith.constant 4 : i32
    %9 = arith.cmpi sge, %arg1, %c4_i32_4 : i32
    %10 = arith.extui %9 : i1 to i32
    %c0_i32_5 = arith.constant 0 : i32
    %11 = arith.cmpi ne, %10, %c0_i32_5 : i32
    scf.if %11 {
      %c0 = arith.constant 0 : index
      %c0_7 = arith.constant 0 : index
      %15 = vector.load %arg3[%c0, %c0_7] : memref<8x256xbf16, #tpu.memory_space<vmem>>, vector<8x256xbf16>
      %16 = arith.extf %15 : vector<8x256xbf16> to vector<8x256xf32>
      %c0_8 = arith.constant 0 : index
      %c0_9 = arith.constant 0 : index
      %17 = vector.load %arg13[%c0_8, %c0_9] : memref<8x128xbf16, #tpu.memory_space<vmem>>, vector<8x128xbf16>
      %c0_10 = arith.constant 0 : index
      %c0_11 = arith.constant 0 : index
      %18 = vector.load %arg6[%c0_10, %c0_11] : memref<128x256xbf16, #tpu.memory_space<vmem>>, vector<128x256xbf16>
      %cst = arith.constant dense<0.000000e+00> : vector<8x256xf32>
      %19 = tpu.matmul %17, %18, %cst {dimension_numbers = #tpu.dot_dimension_numbers<[1], [0], [0], [1], [0, 0, 1, 1], [], []>} : vector<8x128xbf16>, vector<128x256xbf16>, vector<8x256xf32> -> vector<8x256xf32>
      %c0_12 = arith.constant 0 : index
      %c0_13 = arith.constant 0 : index
      %20 = vector.load %arg7[%c0_12, %c0_13] : memref<1x256xf32, #tpu.memory_space<vmem>>, vector<1x256xf32>
      %21 = vector.broadcast %20 : vector<1x256xf32> to vector<8x256xf32>
      %22 = arith.addf %19, %21 : vector<8x256xf32>
      %23 = math.tanh %22 : vector<8x256xf32>
      %c0_14 = arith.constant 0 : index
      %24 = memref.load %arg2[%c0_14] : memref<1xf32, #tpu.memory_space<smem>>
      %25 = vector.broadcast %24 : f32 to vector<8x256xf32>
      %26 = arith.mulf %25, %23 : vector<8x256xf32>
      %27 = arith.addf %16, %26 : vector<8x256xf32>
      %c0_15 = arith.constant 0 : index
      %c0_16 = arith.constant 0 : index
      %28 = vector.load %arg8[%c0_15, %c0_16] : memref<2x256xf32, #tpu.memory_space<vmem>>, vector<1x256xf32>
      %c1 = arith.constant 1 : index
      %c0_17 = arith.constant 0 : index
      %29 = vector.load %arg8[%c1, %c0_17] : memref<2x256xf32, #tpu.memory_space<vmem>>, vector<1x256xf32>
      %30 = vector.broadcast %28 : vector<1x256xf32> to vector<8x256xf32>
      %31 = arith.maximumf %30, %27 : vector<8x256xf32>
      %32 = vector.broadcast %29 : vector<1x256xf32> to vector<8x256xf32>
      %33 = arith.minimumf %32, %31 : vector<8x256xf32>
      %c0_18 = arith.constant 0 : index
      %c0_19 = arith.constant 0 : index
      %34 = vector.load %arg14[%c0_18, %c0_19] : memref<8x128xf32, #tpu.memory_space<vmem>>, vector<8x128xf32>
      %35 = arith.truncf %33 : vector<8x256xf32> to vector<8x256xbf16>
      %c0_20 = arith.constant 0 : index
      %c0_21 = arith.constant 0 : index
      %36 = vector.load %arg9[%c0_20, %c0_21] : memref<256x128xbf16, #tpu.memory_space<vmem>>, vector<256x128xbf16>
      %cst_22 = arith.constant dense<0.000000e+00> : vector<8x128xf32>
      %37 = tpu.matmul %35, %36, %cst_22 {dimension_numbers = #tpu.dot_dimension_numbers<[1], [0], [0], [1], [0, 0, 1, 1], [], []>} : vector<8x256xbf16>, vector<256x128xbf16>, vector<8x128xf32> -> vector<8x128xf32>
      %38 = arith.addf %34, %37 : vector<8x128xf32>
      %c0_23 = arith.constant 0 : index
      %c0_24 = arith.constant 0 : index
      %39 = vector.load %arg14[%c0_23, %c0_24] : memref<8x128xf32, #tpu.memory_space<vmem>>, vector<8x128xf32>
      tpu.vector_store %arg14[%c0_23, %c0_24], %38 {strides = array<i32>} : memref<8x128xf32, #tpu.memory_space<vmem>>, vector<8x128xf32>,
    } else {
    }
    %c7_i32 = arith.constant 7 : i32
    %12 = arith.cmpi eq, %arg1, %c7_i32 : i32
    %13 = arith.extui %12 : i1 to i32
    %c0_i32_6 = arith.constant 0 : i32
    %14 = arith.cmpi ne, %13, %c0_i32_6 : i32
    scf.if %14 {
      %c0 = arith.constant 0 : index
      %c0_7 = arith.constant 0 : index
      %15 = vector.load %arg14[%c0, %c0_7] : memref<8x128xf32, #tpu.memory_space<vmem>>, vector<8x128xf32>
      %16 = arith.mulf %15, %15 : vector<8x128xf32>
      %cst = arith.constant dense<0.000000e+00> : vector<8xf32>
      %17 = vector.multi_reduction <add>, %16, %cst [1] : vector<8x128xf32> to vector<8xf32>
      %18 = vector.shape_cast %17 : vector<8xf32> to vector<8x1xf32>
      %cst_8 = arith.constant 9.99999996E-13 : f32
      %19 = vector.broadcast %cst_8 : f32 to vector<8x1xf32>
      %20 = arith.addf %18, %19 : vector<8x1xf32>
      %21 = math.rsqrt %20 : vector<8x1xf32>
      %22 = vector.broadcast %21 : vector<8x1xf32> to vector<8x128xf32>
      %23 = arith.mulf %15, %22 : vector<8x128xf32>
      %24 = arith.truncf %23 : vector<8x128xf32> to vector<8x128xbf16>
      %c0_9 = arith.constant 0 : index
      %c0_10 = arith.constant 0 : index
      %25 = vector.load %arg10[%c0_9, %c0_10] : memref<128x128xbf16, #tpu.memory_space<vmem>>, vector<128x128xbf16>
      %cst_11 = arith.constant dense<0.000000e+00> : vector<8x128xf32>
      %26 = tpu.matmul %24, %25, %cst_11 {dimension_numbers = #tpu.dot_dimension_numbers<[1], [0], [0], [1], [0, 0, 1, 1], [], []>} : vector<8x128xbf16>, vector<128x128xbf16>, vector<8x128xf32> -> vector<8x128xf32>
      %c0_12 = arith.constant 0 : index
      %c0_13 = arith.constant 0 : index
      %27 = vector.load %arg11[%c0_12, %c0_13] : memref<8x128xf32, #tpu.memory_space<vmem>>, vector<8x128xf32>
      tpu.vector_store %arg11[%c0_12, %c0_13], %26 {strides = array<i32>} : memref<8x128xf32, #tpu.memory_space<vmem>>, vector<8x128xf32>,
    } else {
    }
    return
  }
  func.func @transform_0(%arg0: i32, %arg1: i32) -> i32 {
    %c0_i32 = arith.constant 0 : i32
    %c0_i32_0 = arith.constant 0 : i32
    return %c0_i32 : i32
  }
  func.func @transform_1(%arg0: i32, %arg1: i32) -> (i32, i32) {
    %c4_i32 = arith.constant 4 : i32
    %c0_i32 = arith.constant 0 : i32
    %0 = arith.cmpi eq, %c4_i32, %c0_i32 : i32
    %c1_i32 = arith.constant 1 : i32
    %1 = arith.select %0, %c1_i32, %c4_i32 : i32
    %2 = arith.remsi %arg1, %1 : i32
    %c0_i32_0 = arith.constant 0 : i32
    %3 = arith.cmpi ne, %2, %c0_i32_0 : i32
    %c0_i32_1 = arith.constant 0 : i32
    %4 = arith.cmpi slt, %2, %c0_i32_1 : i32
    %c0_i32_2 = arith.constant 0 : i32
    %5 = arith.cmpi slt, %1, %c0_i32_2 : i32
    %6 = arith.xori %4, %5 : i1
    %7 = arith.andi %6, %3 : i1
    %8 = arith.addi %2, %1 : i32
    %9 = arith.select %7, %8, %2 : i32
    %c0_i32_3 = arith.constant 0 : i32
    return %arg0, %9 : i32, i32
  }
  func.func @transform_2(%arg0: i32, %arg1: i32) -> (i32, i32) {
    %c3_i32 = arith.constant 3 : i32
    %0 = arith.minsi %arg1, %c3_i32 : i32
    %c0_i32 = arith.constant 0 : i32
    %c0_i32_0 = arith.constant 0 : i32
    return %0, %c0_i32 : i32, i32
  }
  func.func @transform_3(%arg0: i32, %arg1: i32) -> (i32, i32) {
    %c0_i32 = arith.constant 0 : i32
    %c0_i32_0 = arith.constant 0 : i32
    %c0_i32_1 = arith.constant 0 : i32
    return %c0_i32, %c0_i32_0 : i32, i32
  }
  func.func @transform_4(%arg0: i32, %arg1: i32) -> (i32, i32) {
    %c4_i32 = arith.constant 4 : i32
    %0 = arith.subi %arg1, %c4_i32 : i32
    %c0_i32 = arith.constant 0 : i32
    %1 = arith.maxsi %0, %c0_i32 : i32
    %c0_i32_0 = arith.constant 0 : i32
    %c0_i32_1 = arith.constant 0 : i32
    return %c0_i32_0, %1 : i32, i32
  }
  func.func @transform_5(%arg0: i32, %arg1: i32) -> (i32, i32) {
    %c4_i32 = arith.constant 4 : i32
    %0 = arith.subi %arg1, %c4_i32 : i32
    %c0_i32 = arith.constant 0 : i32
    %1 = arith.maxsi %0, %c0_i32 : i32
    %c0_i32_0 = arith.constant 0 : i32
    %c0_i32_1 = arith.constant 0 : i32
    return %c0_i32_0, %1 : i32, i32
  }
  func.func @transform_6(%arg0: i32, %arg1: i32) -> (i32, i32) {
    %c4_i32 = arith.constant 4 : i32
    %0 = arith.subi %arg1, %c4_i32 : i32
    %c0_i32 = arith.constant 0 : i32
    %1 = arith.maxsi %0, %c0_i32 : i32
    %c0_i32_0 = arith.constant 0 : i32
    %c0_i32_1 = arith.constant 0 : i32
    return %c0_i32_0, %1 : i32, i32
  }
  func.func @transform_7(%arg0: i32, %arg1: i32) -> (i32, i32) {
    %c4_i32 = arith.constant 4 : i32
    %0 = arith.subi %arg1, %c4_i32 : i32
    %c0_i32 = arith.constant 0 : i32
    %1 = arith.maxsi %0, %c0_i32 : i32
    %c0_i32_0 = arith.constant 0 : i32
    %c0_i32_1 = arith.constant 0 : i32
    return %1, %c0_i32_0 : i32, i32
  }
  func.func @transform_8(%arg0: i32, %arg1: i32) -> (i32, i32) {
    %c0_i32 = arith.constant 0 : i32
    %c0_i32_0 = arith.constant 0 : i32
    %c0_i32_1 = arith.constant 0 : i32
    return %c0_i32, %c0_i32_0 : i32, i32
  }
  func.func @transform_9(%arg0: i32, %arg1: i32) -> (i32, i32) {
    %c0_i32 = arith.constant 0 : i32
    %c0_i32_0 = arith.constant 0 : i32
    return %arg0, %c0_i32 : i32, i32
  }
}

module attributes {stable_mosaic.version = 11 : i64} {
  func.func @_customclip_kernel(%arg0: i32, %arg1: i32, %arg2: memref<1xf32, #tpu.memory_space<smem>>, %arg3: memref<8x256xbf16, #tpu.memory_space<vmem>>, %arg4: memref<256x128xbf16, #tpu.memory_space<vmem>>, %arg5: memref<1x128xf32, #tpu.memory_space<vmem>>, %arg6: memref<128x256xbf16, #tpu.memory_space<vmem>>, %arg7: memref<1x256xf32, #tpu.memory_space<vmem>>, %arg8: memref<2x256xf32, #tpu.memory_space<vmem>>, %arg9: memref<256x128xbf16, #tpu.memory_space<vmem>>, %arg10: memref<128x128xbf16, #tpu.memory_space<vmem>>, %arg11: memref<8x128xf32, #tpu.memory_space<vmem>>, %arg12: memref<8x128xf32, #tpu.memory_space<vmem>>, %arg13: memref<8x128xbf16, #tpu.memory_space<vmem>>, %arg14: memref<8x128xf32, #tpu.memory_space<vmem>>) attributes {dimension_semantics = [#tpu.dimension_semantics<parallel>, #tpu.dimension_semantics<arbitrary>], iteration_bounds = array<i64: 1, 8>, scalar_prefetch = 0 : i64, scratch_operands = 3 : i64, tpu.core_type = #tpu.core_type<tc>, window_params = [{transform_indices = @transform_0, window_bounds = array<i64: 1>}, {transform_indices = @transform_1, window_bounds = array<i64: 8, 256>}, {transform_indices = @transform_2, window_bounds = array<i64: 256, 128>}, {pipeline_mode = #tpu.pipeline_mode<synchronous>, transform_indices = @transform_3, window_bounds = array<i64: 1, 128>}, {transform_indices = @transform_4, window_bounds = array<i64: 128, 256>}, {transform_indices = @transform_5, window_bounds = array<i64: 1, 256>}, {transform_indices = @transform_6, window_bounds = array<i64: 2, 256>}, {transform_indices = @transform_7, window_bounds = array<i64: 256, 128>}, {pipeline_mode = #tpu.pipeline_mode<synchronous>, transform_indices = @transform_8, window_bounds = array<i64: 128, 128>}, {transform_indices = @transform_9, window_bounds = array<i64: 8, 128>}]} {
    %c0_i32 = arith.constant 0 : i32
    %0 = arith.cmpi eq, %arg1, %c0_i32 : i32
    %1 = arith.extui %0 : i1 to i32
    %c0_i32_0 = arith.constant 0 : i32
    %2 = arith.cmpi ne, %1, %c0_i32_0 : i32
    scf.if %2 {
      %cst = arith.constant 0.000000e+00 : f32
      %15 = vector.broadcast %cst : f32 to vector<8x128xf32>
      %c0 = arith.constant 0 : index
      %c0_7 = arith.constant 0 : index
      %16 = vector.load %arg12[%c0, %c0_7] : memref<8x128xf32, #tpu.memory_space<vmem>>, vector<8x128xf32>
      tpu.vector_store %arg12[%c0, %c0_7], %15 {strides = array<i32>} : memref<8x128xf32, #tpu.memory_space<vmem>>, vector<8x128xf32>,
      %cst_8 = arith.constant 0.000000e+00 : f32
      %17 = vector.broadcast %cst_8 : f32 to vector<8x128xf32>
      %c0_9 = arith.constant 0 : index
      %c0_10 = arith.constant 0 : index
      %18 = vector.load %arg14[%c0_9, %c0_10] : memref<8x128xf32, #tpu.memory_space<vmem>>, vector<8x128xf32>
      tpu.vector_store %arg14[%c0_9, %c0_10], %17 {strides = array<i32>} : memref<8x128xf32, #tpu.memory_space<vmem>>, vector<8x128xf32>,
    } else {
    }
    %c4_i32 = arith.constant 4 : i32
    %3 = arith.cmpi slt, %arg1, %c4_i32 : i32
    %4 = arith.extui %3 : i1 to i32
    %c0_i32_1 = arith.constant 0 : i32
    %5 = arith.cmpi ne, %4, %c0_i32_1 : i32
    scf.if %5 {
      %c0 = arith.constant 0 : index
      %c0_7 = arith.constant 0 : index
      %15 = vector.load %arg12[%c0, %c0_7] : memref<8x128xf32, #tpu.memory_space<vmem>>, vector<8x128xf32>
      %c0_8 = arith.constant 0 : index
      %c0_9 = arith.constant 0 : index
      %16 = vector.load %arg3[%c0_8, %c0_9] : memref<8x256xbf16, #tpu.memory_space<vmem>>, vector<8x256xbf16>
      %c0_10 = arith.constant 0 : index
      %c0_11 = arith.constant 0 : index
      %17 = vector.load %arg4[%c0_10, %c0_11] : memref<256x128xbf16, #tpu.memory_space<vmem>>, vector<256x128xbf16>
      %cst = arith.constant dense<0.000000e+00> : vector<8x128xf32>
      %18 = tpu.matmul %16, %17, %cst {dimension_numbers = #tpu.dot_dimension_numbers<[1], [0], [0], [1], [0, 0, 1, 1], [], []>} : vector<8x256xbf16>, vector<256x128xbf16>, vector<8x128xf32> -> vector<8x128xf32>
      %19 = arith.addf %15, %18 : vector<8x128xf32>
      %c0_12 = arith.constant 0 : index
      %c0_13 = arith.constant 0 : index
      %20 = vector.load %arg12[%c0_12, %c0_13] : memref<8x128xf32, #tpu.memory_space<vmem>>, vector<8x128xf32>
      tpu.vector_store %arg12[%c0_12, %c0_13], %19 {strides = array<i32>} : memref<8x128xf32, #tpu.memory_space<vmem>>, vector<8x128xf32>,
    } else {
    }
    %c4_i32_2 = arith.constant 4 : i32
    %6 = arith.cmpi eq, %arg1, %c4_i32_2 : i32
    %7 = arith.extui %6 : i1 to i32
    %c0_i32_3 = arith.constant 0 : i32
    %8 = arith.cmpi ne, %7, %c0_i32_3 : i32
    scf.if %8 {
      %c0 = arith.constant 0 : index
      %c0_7 = arith.constant 0 : index
      %15 = vector.load %arg12[%c0, %c0_7] : memref<8x128xf32, #tpu.memory_space<vmem>>, vector<8x128xf32>
      %c0_8 = arith.constant 0 : index
      %c0_9 = arith.constant 0 : index
      %16 = vector.load %arg5[%c0_8, %c0_9] : memref<1x128xf32, #tpu.memory_space<vmem>>, vector<1x128xf32>
      %17 = vector.broadcast %16 : vector<1x128xf32> to vector<8x128xf32>
      %18 = arith.addf %15, %17 : vector<8x128xf32>
      %19 = arith.mulf %18, %18 : vector<8x128xf32>
      %20 = arith.mulf %18, %19 : vector<8x128xf32>
      %cst = arith.constant 4.471500e-02 : f32
      %21 = vector.broadcast %cst : f32 to vector<8x128xf32>
      %22 = arith.mulf %21, %20 : vector<8x128xf32>
      %23 = arith.addf %18, %22 : vector<8x128xf32>
      %cst_10 = arith.constant 0.797884583 : f32
      %24 = vector.broadcast %cst_10 : f32 to vector<8x128xf32>
      %25 = arith.mulf %24, %23 : vector<8x128xf32>
      %26 = math.tanh %25 : vector<8x128xf32>
      %cst_11 = arith.constant 1.000000e+00 : f32
      %27 = vector.broadcast %cst_11 : f32 to vector<8x128xf32>
      %28 = arith.addf %27, %26 : vector<8x128xf32>
      %cst_12 = arith.constant 5.000000e-01 : f32
      %29 = vector.broadcast %cst_12 : f32 to vector<8x128xf32>
      %30 = arith.mulf %29, %28 : vector<8x128xf32>
      %31 = arith.mulf %18, %30 : vector<8x128xf32>
      %32 = arith.truncf %31 : vector<8x128xf32> to vector<8x128xbf16>
      %c0_13 = arith.constant 0 : index
      %c0_14 = arith.constant 0 : index
      %33 = vector.load %arg13[%c0_13, %c0_14] : memref<8x128xbf16, #tpu.memory_space<vmem>>, vector<8x128xbf16>
      tpu.vector_store %arg13[%c0_13, %c0_14], %32 {strides = array<i32>} : memref<8x128xbf16, #tpu.memory_space<vmem>>, vector<8x128xbf16>,
    } else {
    }
    %c4_i32_4 = arith.constant 4 : i32
    %9 = arith.cmpi sge, %arg1, %c4_i32_4 : i32
    %10 = arith.extui %9 : i1 to i32
    %c0_i32_5 = arith.constant 0 : i32
    %11 = arith.cmpi ne, %10, %c0_i32_5 : i32
    scf.if %11 {
      %c0 = arith.constant 0 : index
      %c0_7 = arith.constant 0 : index
      %15 = vector.load %arg3[%c0, %c0_7] : memref<8x256xbf16, #tpu.memory_space<vmem>>, vector<8x256xbf16>
      %16 = arith.extf %15 : vector<8x256xbf16> to vector<8x256xf32>
      %c0_8 = arith.constant 0 : index
      %c0_9 = arith.constant 0 : index
      %17 = vector.load %arg13[%c0_8, %c0_9] : memref<8x128xbf16, #tpu.memory_space<vmem>>, vector<8x128xbf16>
      %c0_10 = arith.constant 0 : index
      %c0_11 = arith.constant 0 : index
      %18 = vector.load %arg6[%c0_10, %c0_11] : memref<128x256xbf16, #tpu.memory_space<vmem>>, vector<128x256xbf16>
      %cst = arith.constant dense<0.000000e+00> : vector<8x256xf32>
      %19 = tpu.matmul %17, %18, %cst {dimension_numbers = #tpu.dot_dimension_numbers<[1], [0], [0], [1], [0, 0, 1, 1], [], []>} : vector<8x128xbf16>, vector<128x256xbf16>, vector<8x256xf32> -> vector<8x256xf32>
      %c0_12 = arith.constant 0 : index
      %c0_13 = arith.constant 0 : index
      %20 = vector.load %arg7[%c0_12, %c0_13] : memref<1x256xf32, #tpu.memory_space<vmem>>, vector<1x256xf32>
      %21 = vector.broadcast %20 : vector<1x256xf32> to vector<8x256xf32>
      %22 = arith.addf %19, %21 : vector<8x256xf32>
      %23 = math.tanh %22 : vector<8x256xf32>
      %c0_14 = arith.constant 0 : index
      %24 = memref.load %arg2[%c0_14] : memref<1xf32, #tpu.memory_space<smem>>
      %25 = vector.broadcast %24 : f32 to vector<8x256xf32>
      %26 = arith.mulf %25, %23 : vector<8x256xf32>
      %27 = arith.addf %16, %26 : vector<8x256xf32>
      %c0_15 = arith.constant 0 : index
      %c0_16 = arith.constant 0 : index
      %28 = vector.load %arg8[%c0_15, %c0_16] : memref<2x256xf32, #tpu.memory_space<vmem>>, vector<1x256xf32>
      %c1 = arith.constant 1 : index
      %c0_17 = arith.constant 0 : index
      %29 = vector.load %arg8[%c1, %c0_17] : memref<2x256xf32, #tpu.memory_space<vmem>>, vector<1x256xf32>
      %30 = vector.broadcast %28 : vector<1x256xf32> to vector<8x256xf32>
      %31 = arith.maximumf %30, %27 : vector<8x256xf32>
      %32 = vector.broadcast %29 : vector<1x256xf32> to vector<8x256xf32>
      %33 = arith.minimumf %32, %31 : vector<8x256xf32>
      %c0_18 = arith.constant 0 : index
      %c0_19 = arith.constant 0 : index
      %34 = vector.load %arg14[%c0_18, %c0_19] : memref<8x128xf32, #tpu.memory_space<vmem>>, vector<8x128xf32>
      %35 = arith.truncf %33 : vector<8x256xf32> to vector<8x256xbf16>
      %c0_20 = arith.constant 0 : index
      %c0_21 = arith.constant 0 : index
      %36 = vector.load %arg9[%c0_20, %c0_21] : memref<256x128xbf16, #tpu.memory_space<vmem>>, vector<256x128xbf16>
      %cst_22 = arith.constant dense<0.000000e+00> : vector<8x128xf32>
      %37 = tpu.matmul %35, %36, %cst_22 {dimension_numbers = #tpu.dot_dimension_numbers<[1], [0], [0], [1], [0, 0, 1, 1], [], []>} : vector<8x256xbf16>, vector<256x128xbf16>, vector<8x128xf32> -> vector<8x128xf32>
      %38 = arith.addf %34, %37 : vector<8x128xf32>
      %c0_23 = arith.constant 0 : index
      %c0_24 = arith.constant 0 : index
      %39 = vector.load %arg14[%c0_23, %c0_24] : memref<8x128xf32, #tpu.memory_space<vmem>>, vector<8x128xf32>
      tpu.vector_store %arg14[%c0_23, %c0_24], %38 {strides = array<i32>} : memref<8x128xf32, #tpu.memory_space<vmem>>, vector<8x128xf32>,
    } else {
    }
    %c7_i32 = arith.constant 7 : i32
    %12 = arith.cmpi eq, %arg1, %c7_i32 : i32
    %13 = arith.extui %12 : i1 to i32
    %c0_i32_6 = arith.constant 0 : i32
    %14 = arith.cmpi ne, %13, %c0_i32_6 : i32
    scf.if %14 {
      %c0 = arith.constant 0 : index
      %c0_7 = arith.constant 0 : index
      %15 = vector.load %arg14[%c0, %c0_7] : memref<8x128xf32, #tpu.memory_space<vmem>>, vector<8x128xf32>
      %16 = arith.mulf %15, %15 : vector<8x128xf32>
      %cst = arith.constant dense<0.000000e+00> : vector<8xf32>
      %17 = vector.multi_reduction <add>, %16, %cst [1] : vector<8x128xf32> to vector<8xf32>
      %18 = vector.shape_cast %17 : vector<8xf32> to vector<8x1xf32>
      %cst_8 = arith.constant 9.99999996E-13 : f32
      %19 = vector.broadcast %cst_8 : f32 to vector<8x1xf32>
      %20 = arith.addf %18, %19 : vector<8x1xf32>
      %21 = math.rsqrt %20 : vector<8x1xf32>
      %22 = vector.broadcast %21 : vector<8x1xf32> to vector<8x128xf32>
      %23 = arith.mulf %15, %22 : vector<8x128xf32>
      %24 = arith.truncf %23 : vector<8x128xf32> to vector<8x128xbf16>
      %c0_9 = arith.constant 0 : index
      %c0_10 = arith.constant 0 : index
      %25 = vector.load %arg10[%c0_9, %c0_10] : memref<128x128xbf16, #tpu.memory_space<vmem>>, vector<128x128xbf16>
      %cst_11 = arith.constant dense<0.000000e+00> : vector<8x128xf32>
      %26 = tpu.matmul %24, %25, %cst_11 {dimension_numbers = #tpu.dot_dimension_numbers<[1], [0], [0], [1], [0, 0, 1, 1], [], []>} : vector<8x128xbf16>, vector<128x128xbf16>, vector<8x128xf32> -> vector<8x128xf32>
      %c0_12 = arith.constant 0 : index
      %c0_13 = arith.constant 0 : index
      %27 = vector.load %arg11[%c0_12, %c0_13] : memref<8x128xf32, #tpu.memory_space<vmem>>, vector<8x128xf32>
      tpu.vector_store %arg11[%c0_12, %c0_13], %26 {strides = array<i32>} : memref<8x128xf32, #tpu.memory_space<vmem>>, vector<8x128xf32>,
    } else {
    }
    return
  }
  func.func @transform_0(%arg0: i32, %arg1: i32) -> i32 {
    %c0_i32 = arith.constant 0 : i32
    %c0_i32_0 = arith.constant 0 : i32
    return %c0_i32 : i32
  }
  func.func @transform_1(%arg0: i32, %arg1: i32) -> (i32, i32) {
    %c4_i32 = arith.constant 4 : i32
    %c0_i32 = arith.constant 0 : i32
    %0 = arith.cmpi eq, %c4_i32, %c0_i32 : i32
    %c1_i32 = arith.constant 1 : i32
    %1 = arith.select %0, %c1_i32, %c4_i32 : i32
    %2 = arith.remsi %arg1, %1 : i32
    %c0_i32_0 = arith.constant 0 : i32
    %3 = arith.cmpi ne, %2, %c0_i32_0 : i32
    %c0_i32_1 = arith.constant 0 : i32
    %4 = arith.cmpi slt, %2, %c0_i32_1 : i32
    %c0_i32_2 = arith.constant 0 : i32
    %5 = arith.cmpi slt, %1, %c0_i32_2 : i32
    %6 = arith.xori %4, %5 : i1
    %7 = arith.andi %6, %3 : i1
    %8 = arith.addi %2, %1 : i32
    %9 = arith.select %7, %8, %2 : i32
    %c0_i32_3 = arith.constant 0 : i32
    return %arg0, %9 : i32, i32
  }
  func.func @transform_2(%arg0: i32, %arg1: i32) -> (i32, i32) {
    %c3_i32 = arith.constant 3 : i32
    %0 = arith.minsi %arg1, %c3_i32 : i32
    %c0_i32 = arith.constant 0 : i32
    %c0_i32_0 = arith.constant 0 : i32
    return %0, %c0_i32 : i32, i32
  }
  func.func @transform_3(%arg0: i32, %arg1: i32) -> (i32, i32) {
    %c0_i32 = arith.constant 0 : i32
    %c0_i32_0 = arith.constant 0 : i32
    %c0_i32_1 = arith.constant 0 : i32
    return %c0_i32, %c0_i32_0 : i32, i32
  }
  func.func @transform_4(%arg0: i32, %arg1: i32) -> (i32, i32) {
    %c4_i32 = arith.constant 4 : i32
    %0 = arith.subi %arg1, %c4_i32 : i32
    %c0_i32 = arith.constant 0 : i32
    %1 = arith.maxsi %0, %c0_i32 : i32
    %c0_i32_0 = arith.constant 0 : i32
    %c0_i32_1 = arith.constant 0 : i32
    return %c0_i32_0, %1 : i32, i32
  }
  func.func @transform_5(%arg0: i32, %arg1: i32) -> (i32, i32) {
    %c4_i32 = arith.constant 4 : i32
    %0 = arith.subi %arg1, %c4_i32 : i32
    %c0_i32 = arith.constant 0 : i32
    %1 = arith.maxsi %0, %c0_i32 : i32
    %c0_i32_0 = arith.constant 0 : i32
    %c0_i32_1 = arith.constant 0 : i32
    return %c0_i32_0, %1 : i32, i32
  }
  func.func @transform_6(%arg0: i32, %arg1: i32) -> (i32, i32) {
    %c4_i32 = arith.constant 4 : i32
    %0 = arith.subi %arg1, %c4_i32 : i32
    %c0_i32 = arith.constant 0 : i32
    %1 = arith.maxsi %0, %c0_i32 : i32
    %c0_i32_0 = arith.constant 0 : i32
    %c0_i32_1 = arith.constant 0 : i32
    return %c0_i32_0, %1 : i32, i32
  }
  func.func @transform_7(%arg0: i32, %arg1: i32) -> (i32, i32) {
    %c4_i32 = arith.constant 4 : i32
    %0 = arith.subi %arg1, %c4_i32 : i32
    %c0_i32 = arith.constant 0 : i32
    %1 = arith.maxsi %0, %c0_i32 : i32
    %c0_i32_0 = arith.constant 0 : i32
    %c0_i32_1 = arith.constant 0 : i32
    return %1, %c0_i32_0 : i32, i32
  }
  func.func @transform_8(%arg0: i32, %arg1: i32) -> (i32, i32) {
    %c0_i32 = arith.constant 0 : i32
    %c0_i32_0 = arith.constant 0 : i32
    %c0_i32_1 = arith.constant 0 : i32
    return %c0_i32, %c0_i32_0 : i32, i32
  }
  func.func @transform_9(%arg0: i32, %arg1: i32) -> (i32, i32) {
    %c0_i32 = arith.constant 0 : i32
    %c0_i32_0 = arith.constant 0 : i32
    return %arg0, %c0_i32 : i32, i32
  }
}

</mosaic_0001>

<bundles_post_ra>
// kernel: tpu_custom_call.1
= control target key start
LH: loop header
LB: loop body
LE: loop exit
PB: predicated region body
PF: predicated region fallthrough
CT: control target
= control target key end

     0   :  { %s2906_s0 = inlined_call_operand.<no memory space> [shape: f32[1], index: 0, kind: input, shape index: {}]   ;;  %s2907_s1 = inlined_call_operand.hbm [shape: bf16[8,1024], index: 1, kind: input, shape index: {}]   ;;  %s2908_s2 = inlined_call_operand.hbm [shape: bf16[1024,128], index: 2, kind: input, shape index: {}]   ;;  %s2909_s3 = inlined_call_operand.vmem [shape: f32[1,128], index: 3, kind: input, shape index: {}]   ;;  %s2910_s4 = inlined_call_operand.hbm [shape: bf16[128,1024], index: 4, kind: input, shape index: {}]   ;;  %s2911_s5 = inlined_call_operand.hbm [shape: f32[1,1024], index: 5, kind: input, shape index: {}]   ;;  %s2912_s6 = inlined_call_operand.vmem [shape: f32[2,1024], index: 6, kind: input, shape index: {}]   ;;  %s2913_s7 = inlined_call_operand.hbm [shape: bf16[1024,128], index: 7, kind: input, shape index: {}]   ;;  %s2914_s8 = inlined_call_operand.hbm [shape: bf16[128,128], index: 8, kind: input, shape index: {}]   ;;  %s2915_s9 = inlined_call_operand.hbm [shape: f32[8,128], index: 9, kind: output, shape index: {}]  }
   0x1   :  { %2946 = sst [smem:[#allocation35_spill]] %s2908_s2 }
   0x2   :  { %2947 = sst [smem:[#allocation36_spill]] %s2909_s3 }
   0x3   :  { %2948 = sst [smem:[#allocation37_spill]] %s2910_s4 }
   0x4   :  { %2949 = sst [smem:[#allocation38_spill]] %s2911_s5 }
   0x5   :  { %2950 = sst [smem:[#allocation39_spill]] %s2912_s6 }
   0x6   :  { %2951 = sst [smem:[#allocation40_spill]] %s2913_s7 }
   0x7   :  { %2952 = sst [smem:[#allocation41_spill]] %s2914_s8 }
   0x8   :  { %2953 = sst [smem:[#allocation42_spill]] %s2915_s9 }
   0x9   :  { %14 = sst [smem:[#allocation5]] %s2906_s0 }
   0xa   :  { %15 = vsyncpa [#allocation7], 0 }
   0xb   :  { %17 = vsyncpa [#allocation7 + $0x1], 0 }
   0xc   :  { %18 = vsyncpa [#allocation10], 0 }
   0xd   :  { %20 = vsyncpa [#allocation10 + $0x1], 0 }
   0xe   :  { %21 = vsyncpa [#allocation13], 0 }
   0xf   :  { %23 = vsyncpa [#allocation13 + $0x1], 0 }
  0x10   :  { %24 = vsyncpa [#allocation16], 0 }
  0x11   :  { %25 = vsyncpa [#allocation8], 0  ;;  %s2358_s11 = smov 0   ;;  %s2360_s12 = smov 0  }
  0x12   :  { %s2362_s13 = smov 0   ;;  %s2364_s14 = smov 0  }
  0x13   :  { %s2366_s15 = smov 0   ;;  %s2368_s16 = smov 0  }
  0x14   :  { %s2370_s0 = smov 0   ;;  %s2372_s17 = smov 0  }
  0x15   :  { %s2374_s18 = smov 0   ;;  %s2376_s19 = smov 0  }
  0x16   :  { %s2378_s20 = smov 0   ;;  %s2380_s21 = smov 0  }
  0x17 LB: > { %2954 = sst [smem:[#allocation24_spill]] %s2247_s12  ;;  %s40_s22 = sadd.s32 1, %s2283_s20  ;;  %s2287_s21 = sphi %s2380_s21, %s31_s21   ;;  %s2283_s20 = sphi %s2378_s20, %s3023_s20   ;;  %s2279_s19 = sphi %s2376_s19, %s3017_s19   ;;  %s2275_s18 = sphi %s2374_s18, %s3022_s18   ;;  %s2271_s17 = sphi %s2372_s17, %s3021_s17   ;;  %s2267_s0 = sphi %s2370_s0, %s3020_s0   ;;  %s2263_s16 = sphi %s2368_s16, %s3015_s16   ;;  %s2259_s15 = sphi %s2366_s15, %s3014_s15   ;;  %s2255_s14 = sphi %s2364_s14, %s3013_s14   ;;  %s2251_s13 = sphi %s2362_s13, %s3012_s13   ;;  %s2247_s12 = sphi %s2360_s12, %s3011_s12   ;;  %s2243_s11 = sphi %s2358_s11, %s3019_s11  }
  0x18   : > { %2955 = sst [smem:[#allocation25_spill]] %s2251_s13  ;;  %p2921_p0 = scmp.eq.s32.totalorder %s2287_s21, 0 }
  0x19   : > { %2956 = sst [smem:[#allocation26_spill]] %s2259_s15  ;;  %p41_p1 = scmp.ge.s32.totalorder %s40_s22, 8 }
  0x1a   : > { %2957 = sst [smem:[#allocation27_spill]] %s2263_s16  ;;  %p120_p2 = scmp.lt.s32.totalorder %s2283_s20, 3 }
  0x1b   : > { %2958 = sst [smem:[#allocation28_spill]] %s2279_s19  ;;  %s127_s23 = sadd.s32 1, %s2263_s16 }
  0x1c   : > { %2959 = sst [smem:[#allocation29_spill]] %s2283_s20  ;;  %p134_p3 = scmp.ne.s32.totalorder %s2263_s16, %s2259_s15 }
  0x1d   : > { %s3025_s22 = smov (%p41_p1, %s40_s22), 0  ;;  %p140_p6 = scmp.ne.s32.totalorder %s2259_s15, %s2255_s14 }
  0x1e   : > { %2960 = sst [smem:[#allocation30_spill]] %s3025_s22  ;;  %p122_p4 = scmp.lt.s32.totalorder %s3025_s22, 3 }
  0x1f   : > { %s121_s24 = scalar_select %p120_p2, %s2283_s20, 3 }
  0x20   : > { %p2430_p5 = por %p134_p3, %p2921_p0  ;;  %p2920_p7 = scmp.lt.s32.totalorder %s2287_s21, 8 }
  0x21   : > { %s123_s26 = scalar_select %p122_p4, %s3025_s22, 3 }
  0x22   : > { %s2926_s28 = sand.u32 1, %s2287_s21   ;;  %s414_s29 = sand.u32 1, %s2263_s16  }
  0x23   : > { %s124_s27 = ssub.s32 %s121_s24, %s123_s26  ;;  %s1569_s10 = sshll.u32 %s414_s29, 7 }
  0x24   : > { %p125_p8 = scmp.eq.s32.totalorder %s124_s27, 0  ;;  %s1664_s9 = sshll.u32 %s121_s24, 11 }
  0x25   : > { %s2963_s2 = sld [smem:[#allocation35_spill]]  ;;  %s416_s7 = scalar_lea.vmem [#allocation9], %s1569_s10 }
  0x26   : > { %s2441_s30 = scalar_select %p125_p8, %s2263_s16, %s127_s23  }
  0x27   : > { %s425_s4 = sshll.u32 %s416_s7, 4  ;;  %p2452_p9 = pnand %p2920_p7, %p2430_p5  ;;  %s2456_s4 = int_to_ptr.vmem [resolvable:$true] %s425_s4 }
  0x28   : > { %2962 = sst [smem:[#allocation31_spill]] %s2441_s30  ;;  %s2460_s3 = scalar_lea.sflag [#allocation10], %s2926_s28 }
  0x29   : > { %p1967_p11 = pneg %p2452_p9 }
  0x2b   : > { %s2446_s19 = scalar_lea.hbm %s2963_s2, %s1664_s9  ;;  %s1970_s23 = scalar_lea.hbm %s2963_s2, 8192 }
  0x2c   : > { %s1965_s6 = scalar_lea.hbm %s2446_s19, 2048  ;;  %p1971_p1 = scmp.lt.u32.totalorder %s2446_s19, %s2963_s2 }
  0x2d   : > { %p1966_p10 = scmp.ne.s32.totalorder %s2446_s19, %s1965_s6  ;;  %p1972_p2 = scmp.lt.u32.totalorder %s1970_s23, %s1965_s6 }
  0x2e   : > { %p1974_p4 = scmp.lt.u32.totalorder %s1965_s6, %s2446_s19 }
  0x2f   : > { %p1968_p12 = pnand %p1967_p11, %p1966_p10  ;;  %p1973_p3 = por %p1972_p2, %p1971_p1 }
  0x31   : > { %p1969_p13 = pneg %p1968_p12  ;;  %p1975_p5 = por %p1974_p4, %p1973_p3 }
  0x33   : > { %p1976_p8 = pnand %p1975_p5, %p1969_p13 }
  0x35   : > { %1979 = shalt.err (!%p1976_p8)
}
  0x36   : > { %s1980_s27 = scalar_lea.vmem %s2456_s4, 2048  ;;  %s2289_s29 = smov [#allocation9]  }
  0x37   : > { %p1981_p10 = scmp.ne.s32.totalorder %s2456_s4, %s1980_s27  ;;  %s1985_s10 = sshll.u32 %s2289_s29, 4  ;;  %s1986_s10 = int_to_ptr.vmem [resolvable:$false] %s1985_s10 }
  0x38   : > { %s1987_s7 = scalar_lea.vmem %s1986_s10, 4096  ;;  %p1988_p0 = scmp.lt.s32.totalorder %s2456_s4, %s1986_s10 }
  0x39   : > { %p1983_p12 = pnand %p1981_p10, %p1967_p11  ;;  %p1989_p1 = scmp.lt.s32.totalorder %s1987_s7, %s1980_s27 }
  0x3b   : > { %p1984_p7 = pneg %p1983_p12  ;;  %p1990_p2 = por %p1989_p1, %p1988_p0 }
  0x3d   : > { %p1991_p3 = pnand %p1990_p2, %p1984_p7 }
  0x3f   : > { %1994 = shalt.err (!%p1991_p3)
}
  0x40   : > { %s2922_s6 = smov 64   ;;  %s2924_s9 = smov 4  }
  0x41   : > { %1769 = dma.hbm_to_vmem [thread:$0]  (!%p2452_p9), %s2446_s19, 2048, %s2456_s4, %s2460_s3, %s2922_s6, %s2922_s6, %s2924_s9  }
  0x42   : > { %s2492_s23 = sadd.s32 4294967295, %s2287_s21   ;;  %s1552_s24 = sadd.s32 4294967292, %s2283_s20 }
  0x43   : > { %p2928_p0 = scmp.eq.s32.totalorder %s2492_s23, 0  ;;  %p172_p7 = scmp.gt.s32.totalorder %s1552_s24, 0 }
  0x44   : > { %s1553_s25 = sadd.s32 4294967292, %s3025_s22  ;;  %s180_s27 = sadd.s32 1, %s2251_s13 }
  0x45   : > { %p2503_p11 = por %p140_p6, %p2928_p0  ;;  %p175_p9 = scmp.gt.s32.totalorder %s1553_s25, 0 }
  0x46   : > { %s3027_s24 = smov (!%p172_p7, %s1552_s24), 0  ;;  %p187_p13 = scmp.ne.s32.totalorder %s2251_s13, %s2247_s12 }
  0x47   : > { %s2965_s26 = scalar_select %p2503_p11, 1, 0 }
  0x48   : > { %s3029_s25 = smov (!%p175_p9, %s1553_s25), 0  ;;  %p193_p4 = scmp.ne.s32.totalorder %s2247_s12, %s2243_s11 }
  0x49   : > { %2966 = sst [smem:[#allocation32_spill]] %s2965_s26  ;;  %s177_s4 = ssub.s32 %s3027_s24, %s3029_s25 }
  0x4a   : > { %p178_p5 = scmp.eq.s32.totalorder %s177_s4, 0  ;;  %p2967_p8 = scmp.eq.s32.totalorder %s2287_s21, 0 }
  0x4b   : > { %p2518_p12 = por %p193_p4, %p2928_p0  ;;  %s437_s19 = sand.u32 1, %s2251_s13  }
  0x4c   : > { %p189_p10 = por %p187_p13, %p2967_p8  ;;  %s2526_s10 = sshll.u32 %s437_s19, 7 }
  0x4d   : > { %s2968_s14 = scalar_select %p2518_p12, 1, 0 }
  0x4e   : > { %s2524_s29 = scalar_select %p178_p5, %s2251_s13, %s180_s27  }
  0x4f   : > { %2969 = sst [smem:[#allocation33_spill]] %s2968_s14  ;;  %p2971_p6 = scmp.lt.s32.totalorder %s2287_s21, 8 }
  0x50   : > { %2970 = sst [smem:[#allocation34_spill]] %s2524_s29  ;;  %s439_s11 = scalar_lea.vmem [#allocation11], %s2526_s10 }
  0x51   : > { %p2530_p1 = pnand %p2971_p6, %p189_p10  ;;  %s449_s25 = sshll.u32 %s439_s11, 4  ;;  %s2535_s25 = int_to_ptr.vmem [resolvable:$true] %s449_s25 }
  0x52   : > { %s1576_s4 = sshll.u32 %s437_s19, 1  ;;  %s1666_s6 = sshll.u32 %s3027_s24, 5 }
  0x53   : > { %s2972_s7 = scalar_select %p2530_p1, 1, 0 }
  0x54   : > { %s2973_s5 = sld [smem:[#allocation38_spill]]  ;;  %s463_s2 = scalar_lea.vmem [#allocation12], %s1576_s4 }
  0x55   : > { %s474_s30 = sshll.u32 %s463_s2, 4  ;;  %s2974_s16 = sand.u32 1, %s2287_s21   ;;  %s2543_s30 = int_to_ptr.vmem [resolvable:$true] %s474_s30 }
  0x56   : > { %s2547_s29 = scalar_lea.sflag [#allocation13], %s2974_s16  ;;  %p2553_p3 = pneg %p2530_p1 }
  0x58   : > { %s2975_s19 = scalar_select %p2553_p3, 1, 0 }
  0x5a   : > { %s2541_s27 = scalar_lea.hbm %s2973_s5, %s1666_s6  ;;  %s2000_s2 = scalar_lea.hbm %s2973_s5, 128 }
  0x5b   : > { %s1995_s11 = scalar_lea.hbm %s2541_s27, 32  ;;  %p2001_p13 = scmp.lt.u32.totalorder %s2541_s27, %s2973_s5 }
  0x5c   : > { %p1996_p2 = scmp.ne.s32.totalorder %s2541_s27, %s1995_s11  ;;  %p2002_p4 = scmp.lt.u32.totalorder %s2000_s2, %s1995_s11 }
  0x5d   : > { %p2004_p8 = scmp.lt.u32.totalorder %s1995_s11, %s2541_s27 }
  0x5e   : > { %p1998_p7 = pnand %p2553_p3, %p1996_p2  ;;  %p2003_p5 = por %p2002_p4, %p2001_p13 }
  0x60   : > { %p1999_p9 = pneg %p1998_p7  ;;  %p2005_p10 = por %p2004_p8, %p2003_p5 }
  0x62   : > { %p2006_p6 = pnand %p2005_p10, %p1999_p9 }
  0x64   : > { %2009 = shalt.err (!%p2006_p6)
}
  0x65   : > { %s2010_s16 = scalar_lea.vmem %s2543_s30, 32  ;;  %s2292_s28 = smov [#allocation12]  }
  0x66   : > { %p2011_p2 = scmp.ne.s32.totalorder %s2543_s30, %s2010_s16  ;;  %s2015_s6 = sshll.u32 %s2292_s28, 4  ;;  %s2016_s6 = int_to_ptr.vmem [resolvable:$false] %s2015_s6 }
  0x67   : > { %s2017_s9 = scalar_lea.vmem %s2016_s6, 64  ;;  %p2018_p12 = scmp.lt.s32.totalorder %s2543_s30, %s2016_s6 }
  0x68   : > { %p2013_p7 = pnand %p2011_p2, %p2553_p3  ;;  %p2019_p11 = scmp.lt.s32.totalorder %s2017_s9, %s2010_s16 }
  0x6a   : > { %p2014_p0 = pneg %p2013_p7  ;;  %p2020_p13 = por %p2019_p11, %p2018_p12 }
  0x6c   : > { %p2021_p4 = pnand %p2020_p13, %p2014_p0 }
  0x6e   : > { %2024 = shalt.err (!%p2021_p4)
}
  0x6f   : > { %1775 = dma.hbm_to_vmem [thread:$0]  (!%p2530_p1), %s2541_s27, 32, %s2543_s30, %s2547_s29  }
  0x70   : > { %s500_s11 = scalar_lea.vmem [#allocation14], %s2526_s10  ;;  %p1560_p9 = scmp.ge.s32.totalorder %s2287_s21, 1 }
  0x71   : > { %s510_s2 = sshll.u32 %s500_s11, 4  ;;  %p347_p11 = scmp.lt.s32.totalorder %s2287_s21, 9  ;;  %s2578_s2 = int_to_ptr.vmem [resolvable:$true] %s510_s2 }
  0x72   : > { %s2293_s16 = smov [#allocation15]   ;;  %p2977_p5 = scmp.eq.s32.totalorder %s2492_s23, 0 }
  0x73   : > { %p2582_p0 = pnand %p1560_p9, %p347_p11  ;;  %s365_s28 = sshll.u32 %s2293_s16, 4  ;;  %s366_s28 = int_to_ptr.vmem [resolvable:$true] %s365_s28 }
  0x74   : > { %s69_s30 = ssub.s32 0, %s2283_s20  ;;  %s2979_s8 = sld [smem:[#allocation41_spill]] }
  0x75   : > { %s2976_s4 = scalar_select %p2582_p0, 1, 0 }
  0x76   : > { %p1759_p12 = pneg %p2582_p0  ;;  %s1546_s10 = smin.u32 %s2283_s20, %s69_s30 }
  0x78   : > { %p2590_p8 = pnand %p1759_p12, %p2977_p5 }
  0x7a   : > { %s2025_s11 = scalar_lea.hbm %s2979_s8, 1024  ;;  %p2027_p6 = pneg %p2590_p8 }
  0x7b   : > { %p2026_p10 = scmp.ne.s32.totalorder %s2979_s8, %s2025_s11  ;;  %p2032_p13 = scmp.lt.u32.totalorder %s2025_s11, %s2979_s8 }
  0x7d   : > { %p2028_p2 = pnand %p2027_p6, %p2026_p10 }
  0x7f   : > { %p2029_p7 = pneg %p2028_p2 }
  0x81   : > { %p2034_p4 = pnand %p2032_p13, %p2029_p7 }
  0x83   : > { %2037 = shalt.err (!%p2034_p4)
}
  0x84   : > { %s2038_s12 = scalar_lea.vmem %s366_s28, 1024  ;;  %p2046_p5 = scmp.lt.s32.totalorder %s366_s28, %s366_s28 }
  0x85   : > { %p2039_p9 = scmp.ne.s32.totalorder %s366_s28, %s2038_s12  ;;  %p2047_p0 = scmp.lt.s32.totalorder %s2038_s12, %s2038_s12 }
  0x87   : > { %p2041_p11 = pnand %p2039_p9, %p2027_p6  ;;  %p2048_p1 = por %p2047_p0, %p2046_p5 }
  0x89   : > { %p2042_p12 = pneg %p2041_p11 }
  0x8b   : > { %p2049_p3 = pnand %p2048_p1, %p2042_p12 }
  0x8d   : > { %2052 = shalt.err (!%p2049_p3)
}
  0x8e   : > { %s2980_s5 = smov 4   ;;  %s2981_s13 = smov 64  }
  0x8f   : > { %1762 = dma.hbm_to_vmem [thread:$0]  (!%p2590_p8), %s2979_s8, 1024, %s366_s28, [#allocation16], %s2981_s13, %s2981_s13, %s2980_s5  }
  0x90   : > { %s71_s12 = sand.u32 3, %s1546_s10   ;;  %s81_s14 = ssub.s32 0, %s3025_s22 }
  0x91   : > { %s1549_s6 = smin.u32 %s81_s14, %s3025_s22  ;;  %s97_s9 = sadd.s32 1, %s2275_s18 }
  0x92   : > { %p1548_p1 = scmp.lt.s32.totalorder %s71_s12, 0  ;;  %s78_s11 = sadd.s32 4, %s71_s12 }
  0x93   : > { %s83_s16 = sand.u32 3, %s1549_s6   ;;  %p104_p3 = scmp.ne.s32.totalorder %s2275_s18, %s2271_s17 }
  0x94   : > { %s3031_s11 = smov (!%p1548_p1, %s78_s11), %s71_s12  ;;  %p2982_p0 = scmp.eq.s32.totalorder %s2287_s21, 0 }
  0x95   : > { %p110_p6 = scmp.ne.s32.totalorder %s2271_s17, %s2267_s0  ;;  %s379_s27 = sand.u32 1, %s2275_s18  }
  0x96   : > { %p2622_p10 = por %p2982_p0, %p104_p3  ;;  %p1551_p8 = scmp.lt.s32.totalorder %s83_s16, 0 }
  0x97   : > { %s90_s28 = sadd.s32 4, %s83_s16  ;;  %p2984_p2 = scmp.eq.s32.totalorder %s2492_s23, 0 }
  0x98   : > { %s3033_s28 = smov (!%p1551_p8, %s90_s28), %s83_s16  ;;  %s1563_s14 = sshll.u32 %s379_s27, 3 }
  0x99   : > { %p2631_p7 = por %p2984_p2, %p110_p6  ;;  %s1663_s6 = sshll.u32 %s3031_s11, 7 }
  0x9a   : > { %s93_s12 = ssub.s32 %s3031_s11, %s3033_s28  ;;  %s2638_s20 = scalar_lea.hbm %s2907_s1, %s1663_s6 }
  0x9b   : > { %s2985_s10 = scalar_select %p2631_p7, 1, 0 }
  0x9c   : > { %p95_p13 = scmp.eq.s32.totalorder %s93_s12, 0  ;;  %s383_s0 = scalar_lea.vmem [#allocation6], %s1563_s14 }
  0x9d   : > { %s405_s26 = sshll.u32 %s383_s0, 4  ;;  %p2986_p4 = scmp.lt.s32.totalorder %s2287_s21, 8  ;;  %s2651_s26 = int_to_ptr.vmem [resolvable:$true] %s405_s26 }
  0x9e   : > { %s2649_s11 = scalar_select %p95_p13, %s2275_s18, %s97_s9  }
  0x9f   : > { %p2644_p9 = pnand %p2986_p4, %p2622_p10  ;;  %s380_s8 = scalar_lea.sflag [#allocation7], %s379_s27 }
  0xa0   : > { %s2053_s22 = scalar_lea.hbm %s2638_s20, 128  ;;  %s2058_s28 = scalar_lea.hbm %s2907_s1, 512 }
  0xa1   : > { %p2054_p11 = scmp.ne.s32.totalorder %s2638_s20, %s2053_s22  ;;  %p2055_p12 = pneg %p2644_p9 }
  0xa2   : > { %p2059_p3 = scmp.lt.u32.totalorder %s2638_s20, %s2907_s1  ;;  %p2060_p0 = scmp.lt.u32.totalorder %s2058_s28, %s2053_s22 }
  0xa3   : > { %p2056_p5 = pnand %p2055_p12, %p2054_p11  ;;  %p2062_p6 = scmp.lt.u32.totalorder %s2053_s22, %s2638_s20 }
  0xa4   : > { %p2061_p10 = por %p2060_p0, %p2059_p3 }
  0xa5   : > { %p2057_p1 = pneg %p2056_p5 }
  0xa6   : > { %p2063_p8 = por %p2062_p6, %p2061_p10 }
  0xa8   : > { %p2064_p2 = pnand %p2063_p8, %p2057_p1 }
  0xaa   : > { %2067 = shalt.err (!%p2064_p2)
}
  0xab   : > { %s2068_s9 = scalar_lea.vmem %s2651_s26, 128  ;;  %s2294_s27 = smov [#allocation6]  }
  0xac   : > { %p2069_p13 = scmp.ne.s32.totalorder %s2651_s26, %s2068_s9  ;;  %s2073_s12 = sshll.u32 %s2294_s27, 4  ;;  %s2074_s12 = int_to_ptr.vmem [resolvable:$false] %s2073_s12 }
  0xad   : > { %s2075_s0 = scalar_lea.vmem %s2074_s12, 256  ;;  %p2076_p5 = scmp.lt.s32.totalorder %s2651_s26, %s2074_s12 }
  0xae   : > { %p2071_p4 = pnand %p2069_p13, %p2055_p12  ;;  %p2077_p3 = scmp.lt.s32.totalorder %s2075_s0, %s2068_s9 }
  0xb0   : > { %p2072_p11 = pneg %p2071_p4  ;;  %p2078_p0 = por %p2077_p3, %p2076_p5 }
  0xb2   : > { %p2079_p10 = pnand %p2078_p0, %p2072_p11 }
  0xb4   : > { %2082 = shalt.err (!%p2079_p10)
}
  0xb5   : > { %1766 = dma.hbm_to_vmem [thread:$0]  (!%p2644_p9), %s2638_s20, 128, %s2651_s26, %s380_s8  }
  0xb6   : > { %s1665_s22 = sshll.u32 %s3027_s24, 7  ;;  %s2988_s28 = sld [smem:[#allocation37_spill]] }
  0xb7   : > { %s1667_s6 = sshll.u32 %s3027_s24, 11  ;;  %p2989_p1 = scmp.ne.s32.totalorder %s2975_s19, 0 }
  0xbc   : > { %s2682_s14 = scalar_lea.hbm %s2988_s28, %s1665_s22  ;;  %s2088_s20 = scalar_lea.hbm %s2988_s28, 8192 }
  0xbd   : > { %s2083_s9 = scalar_lea.hbm %s2682_s14, 2048  ;;  %p2089_p9 = scmp.lt.u32.totalorder %s2682_s14, %s2988_s28 }
  0xbe   : > { %p2084_p12 = scmp.ne.s32.totalorder %s2682_s14, %s2083_s9  ;;  %p2090_p2 = scmp.lt.u32.totalorder %s2088_s20, %s2083_s9 }
  0xbf   : > { %p2092_p4 = scmp.lt.u32.totalorder %s2083_s9, %s2682_s14 }
  0xc0   : > { %p2086_p6 = pnand %p2084_p12, %p2989_p1  ;;  %p2091_p13 = por %p2090_p2, %p2089_p9 }
  0xc2   : > { %p2087_p8 = pneg %p2086_p6  ;;  %p2093_p11 = por %p2092_p4, %p2091_p13 }
  0xc4   : > { %p2094_p5 = pnand %p2093_p11, %p2087_p8 }
  0xc6   : > { %2097 = shalt.err (!%p2094_p5)
}
  0xc7   : > { %s2098_s12 = scalar_lea.vmem %s2535_s25, 2048  ;;  %s2295_s0 = smov [#allocation11]  }
  0xc8   : > { %p2099_p3 = scmp.ne.s32.totalorder %s2535_s25, %s2098_s12  ;;  %s2103_s22 = sshll.u32 %s2295_s0, 4  ;;  %s2104_s22 = int_to_ptr.vmem [resolvable:$false] %s2103_s22 }
  0xc9   : > { %s2105_s16 = scalar_lea.vmem %s2104_s22, 4096  ;;  %p2106_p12 = scmp.lt.s32.totalorder %s2535_s25, %s2104_s22 }
  0xca   : > { %p2101_p0 = pnand %p2099_p3, %p2989_p1  ;;  %p2107_p6 = scmp.lt.s32.totalorder %s2105_s16, %s2098_s12 }
  0xcc   : > { %p2102_p10 = pneg %p2101_p0  ;;  %p2108_p9 = por %p2107_p6, %p2106_p12 }
  0xce   : > { %p2109_p2 = pnand %p2108_p9, %p2102_p10 }
  0xd0   : > { %2112 = shalt.err (!%p2109_p2)
}
  0xd1   : > { %s2296_s30 = smov 512   ;;  %s2297_s9 = smov 128  }
  0xd2   : > { %s2298_s15 = smov 8   ;;  %p2990_p8 = scmp.ne.s32.totalorder %s2972_s7, 0 }
  0xd3   : > { %s2991_s26 = sld [smem:[#allocation40_spill]] }
  0xd4   : > { %1772 = dma.hbm_to_vmem [thread:$0]  (!%p2990_p8), %s2682_s14, 2048, %s2535_s25, %s2460_s3, %s2296_s30, %s2297_s9, %s2298_s15  }
  0xd9   : > { %s2712_s8 = scalar_lea.hbm %s2991_s26, %s1667_s6  ;;  %s2118_s16 = scalar_lea.hbm %s2991_s26, 8192 }
  0xda   : > { %s2113_s12 = scalar_lea.hbm %s2712_s8, 2048  ;;  %p2119_p5 = scmp.lt.u32.totalorder %s2712_s8, %s2991_s26 }
  0xdb   : > { %p2114_p13 = scmp.ne.s32.totalorder %s2712_s8, %s2113_s12  ;;  %p2120_p3 = scmp.lt.u32.totalorder %s2118_s16, %s2113_s12 }
  0xdc   : > { %p2122_p10 = scmp.lt.u32.totalorder %s2113_s12, %s2712_s8 }
  0xdd   : > { %p2116_p4 = pnand %p2114_p13, %p2989_p1  ;;  %p2121_p0 = por %p2120_p3, %p2119_p5 }
  0xdf   : > { %p2117_p11 = pneg %p2116_p4  ;;  %p2123_p12 = por %p2122_p10, %p2121_p0 }
  0xe1   : > { %p2124_p6 = pnand %p2123_p12, %p2117_p11 }
  0xe3   : > { %2127 = shalt.err (!%p2124_p6)
}
  0xe4   : > { %s2128_s25 = scalar_lea.vmem %s2578_s2, 2048  ;;  %s2299_s14 = smov [#allocation14]  }
  0xe5   : > { %p2129_p9 = scmp.ne.s32.totalorder %s2578_s2, %s2128_s25  ;;  %s2133_s6 = sshll.u32 %s2299_s14, 4  ;;  %s2134_s6 = int_to_ptr.vmem [resolvable:$false] %s2133_s6 }
  0xe6   : > { %s2135_s30 = scalar_lea.vmem %s2134_s6, 4096  ;;  %p2136_p4 = scmp.lt.s32.totalorder %s2578_s2, %s2134_s6 }
  0xe7   : > { %p2131_p2 = pnand %p2129_p9, %p2989_p1  ;;  %p2137_p7 = scmp.lt.s32.totalorder %s2135_s30, %s2128_s25 }
  0xe9   : > { %p2132_p13 = pneg %p2131_p2  ;;  %p2138_p5 = por %p2137_p7, %p2136_p4 }
  0xeb   : > { %p2139_p3 = pnand %p2138_p5, %p2132_p13 }
  0xed   : > { %2142 = shalt.err (!%p2139_p3)
}
  0xee   : > { %1778 = dma.hbm_to_vmem [thread:$0]  (!%p2990_p8), %s2712_s8, 2048, %s2578_s2, %s2547_s29, %s2981_s13, %s2981_s13, %s2980_s5  }
  0xef   : > { %p2992_p1 = scmp.ne.s32.totalorder %s2976_s4, 0 }
  0xf0   : > { %s524_s19 = sand.u32 (!%p2992_p1), 1, %s2271_s17   ;;  %p2993_p7 = scmp.ne.s32.totalorder (!%p2992_p1), %s2985_s10, 0 }
  0xf1   : > { %522 = sbr.rel (%p2992_p1) target bundleno = 1505 (0x5e1), region = 56  ;;  %s2742_s9 = sshll.u32 (!%p2992_p1), %s524_s19, 3 }
  0xf2   : > { %s525_s15 = scalar_lea.sflag (!%p2992_p1), [#allocation7], %s524_s19  ;;  %s528_s27 = scalar_lea.vmem (!%p2992_p1), [#allocation6], %s2742_s9 }
  0xf8   : > { %2218 = dma.done.wait (%p2993_p7), %s525_s15, 128  }
  0xf9   : > { %2220 = vsyncadd (%p2993_p7), %s525_s15, 4294967168  ;;  %s2994_s7 = sld [smem:[#allocation26_spill]]  ;;  %s2995_s20 = sld [smem:[#allocation32_spill]] }
  0xfa   : > { %s533_s29 = sand.u32 1, %s2492_s23  }
  0xfb   : > { %s534_s5 = scalar_lea.sflag [#allocation10], %s533_s29 }
  0xff   : > { %s535_s2 = sand.u32 1, %s2994_s7   ;;  %p2996_p8 = scmp.ne.s32.totalorder %s2995_s20, 0 }
 0x100   : > { %s1586_s4 = sshll.u32 %s535_s2, 7 }
 0x101   : > { %s2751_s13 = scalar_lea.vmem [#allocation9], %s1586_s4 }
 0x102   : > { %2222 = dma.done.wait (%p2996_p8), %s534_s5, 2048  }
 0x103   : > { %2224 = vsyncadd (%p2996_p8), %s534_s5, 4294965248  ;;  %s2997_s8 = sld [smem:[#allocation24_spill]]  ;;  %s2998_s12 = sld [smem:[#allocation33_spill]] }
 0x109   : > { %s544_s0 = sand.u32 1, %s2997_s8   ;;  %p2999_p11 = scmp.ne.s32.totalorder %s2998_s12, 0 }
 0x10a   : > { %s1587_s22 = sshll.u32 %s544_s0, 7 }
 0x10b   : > { %s2758_s10 = scalar_lea.vmem [#allocation11], %s1587_s22 }
 0x10c   : > { %2226 = dma.done.wait (%p2999_p11), %s534_s5, 2048  }
 0x10d   : > { %2228 = vsyncadd (%p2999_p11), %s534_s5, 4294965248  ;;  %s2764_s16 = sshll.u32 %s544_s0, 1  ;;  %s552_s3 = scalar_lea.sflag [#allocation13], %s533_s29 }
 0x10e   : > { %s555_s24 = scalar_lea.vmem [#allocation12], %s2764_s16 }
 0x10f   : > { %2230 = dma.done.wait (%p2999_p11), %s552_s3, 2080  }
 0x110   : > { %2232 = vsyncadd (%p2999_p11), %s552_s3, 4294965216  ;;  %s2771_s25 = scalar_lea.vmem [#allocation14], %s1587_s22  ;;  %p3000_p0 = scmp.eq.s32.totalorder %s2492_s23, 0 }
 0x112   : > { %2234 = dma.done.wait (%p3000_p0), [#allocation16], 1024   ;;  %p3001_p10 = pmov %p3000_p0 }
 0x113   : > { %s3002_s14 = sld [smem:[#allocation28_spill]]  ;;  %s3003_s20 = sld [smem:[#allocation39_spill]] }
 0x114   : > { %2236 = vsyncadd (%p3001_p10), [#allocation16], 4294966272 }
 0x119   : > { %s1591_s6 = sadd.s32 4294967292, %s3002_s14  ;;  %p1594_p9 = scmp.ne.s32.totalorder %s3002_s14, 0 }
 0x11a   : > { %p651_p12 = scmp.gt.s32.totalorder %s1591_s6, 0  ;;  %v2300_v0 = vmov (!%p1594_p9), 0.0  }
 0x11b   : > { %671 = vst [vmem:[#allocation2] sm:$0xff] (!%p1594_p9), %v2300_v0  ;;  %672 = vst [vmem:[#allocation4] sm:$0xff] (!%p1594_p9), %v2300_v0 }
 0x11c   : > { %s3035_s6 = smov (!%p651_p12, %s1591_s6), 0  ;;  %670 = sbr.rel (%p1594_p9) target bundleno = 291 (0x123), region = 84 }
 0x11d   : > { %s1592_s30 = sshll.u32 %s3035_s6, 1 }
 0x11e   : > { %p654_p6 = scmp.lt.s32.totalorder %s1592_s30, 7 }
 0x120   : > { %s3037_s30 = smov (!%p654_p6, %s1592_s30), 7 }
 0x121   : > { %s1593_s19 = sshll.u32 %s3037_s30, 1 }
 0x122   : > { %s2781_s29 = scalar_lea.vmem %s3003_s20, %s1593_s19 }
 0x123 PF: > { %s3004_s2 = sld [smem:[#allocation28_spill]] }
 0x129   : > { %p1595_p2 = scmp.ge.s32.totalorder %s3004_s2, 4 }
 0x12a   : > { %v1891_v1 = vld [vmem:[%s2751_s13 + $0x40] sm:$0xff] (!%p1595_p2)   ;;  %v1893_v3 = vld [vmem:[%s2751_s13 + $0x48] sm:$0xff] (!%p1595_p2)   ;;  %v1895_v5 = vld [vmem:[%s2751_s13 + $0x50] sm:$0xff] (!%p1595_p2)  }
 0x12b   : > { %676 = sbr.rel (%p1595_p2) target bundleno = 549 (0x225), region = 88  ;;  %v1892_v2 = vld [vmem:[%s2751_s13] sm:$0xff] (!%p1595_p2)   ;;  %1668 = vmatprep.subr.bf16.mxu0 (!%p1595_p2), %v1891_v1  ;;  %v1894_v4 = vld [vmem:[%s2751_s13 + $0x8] sm:$0xff] (!%p1595_p2)   ;;  %v1896_v6 = vld [vmem:[%s2751_s13 + $0x10] sm:$0xff] (!%p1595_p2)  }
 0x12c   : > { %1669 = vmatpush3.bf16.msra.mxu0 (!%p1595_p2), %v1892_v2  ;;  %v1897_v7 = vld [vmem:[%s2751_s13 + $0x58] sm:$0xff] (!%p1595_p2)   ;;  %v1899_v9 = vld [vmem:[%s2751_s13 + $0x60] sm:$0xff] (!%p1595_p2)   ;;  %v1901_v11 = vld [vmem:[%s2751_s13 + $0x68] sm:$0xff] (!%p1595_p2)  }
 0x12d   : > { %1670 = vmatprep.subr.bf16.mxu0 (!%p1595_p2), %v1893_v3  ;;  %v1898_v8 = vld [vmem:[%s2751_s13 + $0x18] sm:$0xff] (!%p1595_p2)   ;;  %v1900_v10 = vld [vmem:[%s2751_s13 + $0x20] sm:$0xff] (!%p1595_p2)   ;;  %v1902_v14 = vld [vmem:[%s2751_s13 + $0x28] sm:$0xff] (!%p1595_p2)  }
 0x12e   : > { %v678_v12 = vld [vmem:[%s528_s27] sm:$0xff] (!%p1595_p2) }
 0x12f   : > { %v1597_v13 = vcombine.high (!%p1595_p2), %v678_v12, %v678_v12  ;;  %v1903_v15 = vld [vmem:[%s2751_s13 + $0x70] sm:$0xff] (!%p1595_p2)   ;;  %v1905_v17 = vld [vmem:[%s2751_s13 + $0x78] sm:$0xff] (!%p1595_p2)   ;;  %v1596_v19 = vcombine.low (!%p1595_p2), %v678_v12, %v678_v12 }
 0x130   : > { %1671 = vmatpush3.bf16.msra.mxu0 (!%p1595_p2), %v1894_v4  ;;  %v1904_v16 = vld [vmem:[%s2751_s13 + $0x30] sm:$0xff] (!%p1595_p2)   ;;  %v1906_v18 = vld [vmem:[%s2751_s13 + $0x38] sm:$0xff] (!%p1595_p2)  }
 0x131   : > { %1672 = vmatprep.subr.bf16.mxu0 (!%p1595_p2), %v1895_v5  ;;  %846 = vmatprep.mubr.bf16.mxu0 (!%p1595_p2), %v1597_v13  ;;  %v677_v21 = vld [vmem:[#allocation2] sm:$0xff] (!%p1595_p2) }
 0x134   : > { %1673 = vmatpush3.bf16.msra.mxu0 %v1896_v6 }
 0x135   : > { %1674 = vmatprep.subr.bf16.mxu0 %v1897_v7 }
 0x138   : > { %1675 = vmatpush3.bf16.msra.mxu0 %v1898_v8 }
 0x139   : > { %1676 = vmatprep.subr.bf16.mxu0 %v1899_v9 }
 0x13c   : > { %1677 = vmatpush3.bf16.msra.mxu0 %v1900_v10 }
 0x13d   : > { %1678 = vmatprep.subr.bf16.mxu0 %v1901_v11 }
 0x140   : > { %1679 = vmatpush3.bf16.msra.mxu0 %v1902_v14 }
 0x141   : > { %1680 = vmatprep.subr.bf16.mxu0 %v1903_v15 }
 0x144   : > { %1681 = vmatpush3.bf16.msra.mxu0 %v1904_v16 }
 0x145   : > { %1682 = vmatprep.subr.bf16.mxu0 %v1905_v17 }
 0x148   : > { %1683 = vmatpush3.bf16.msra.mxu0 %v1906_v18 }
 0x14b   : > { %847 = vmatmul.mubr.bf16.vlgmr.msra.gmra.mrb[0].mxu0 %v1596_v19 }
 0x21e   : > { %v1684_v20 = vpop.f32.mrb[0].mxu0 }
 0x21f   : > { %v1685_v22 = vpop.f32.mrb[1].mxu0 }
 0x220   : > { %v1686_v23 = vadd.f32 %v1685_v22, %v1684_v20  ;;  %v1687_v24 = vpop.f32.mrb[2].mxu0 }
 0x221   : > { %v1688_v25 = vpop.f32.mrb[3].mxu0 }
 0x222   : > { %v854_v26 = vadd.f32 %v1686_v23, %v677_v21 }
 0x224   : > { %855 = vst [vmem:[#allocation2] sm:$0xff] %v854_v26 }
 0x225 PF: > { %s3005_s4 = sld [smem:[#allocation28_spill]] }
 0x22b   : > { %p1614_p13 = scmp.ne.s32.totalorder %s3005_s4, 4 }
 0x22c   : > { %v860_v27 = vld [vmem:[#allocation2] sm:$0xff] (!%p1614_p13)  ;;  %s3006_s13 = sld [smem:[#allocation36_spill]] (!%p1614_p13) }
 0x22d   : > { %859 = sbr.rel (%p1614_p13) target bundleno = 595 (0x253), region = 92 }
 0x232   : > { %v1615_v28 = vld [vmem:[%s3006_s13] ss:$0 sm:$0xff] (!%p1614_p13) }
 0x233   : > { %v868_v29 = vadd.f32 (!%p1614_p13), %v1615_v28, %v860_v27 }
 0x235   : > { %v869_v30 = vmul.f32 %v868_v29, %v868_v29 }
 0x237   : > { %v870_v31 = vmul.f32 %v869_v30, %v868_v29 }
 0x239   : > { %v871_v32 = vmul.f32 0.044715, %v870_v31 }
 0x23b   : > { %v872_v33 = vadd.f32 %v871_v32, %v868_v29 }
 0x23d   : > { %v873_v34 = vmul.f32 0.7978846, %v872_v33 }
 0x23f   : > { %1909 = vtanh.f32 %v873_v34 }
 0x249   : > { %v1910_v35 = vpop.eup %1909 }
 0x24a   : > { %v875_v36 = vadd.f32 1.0, %v1910_v35 }
 0x24c   : > { %v876_v37 = vmul.f32 0.5, %v875_v36 }
 0x24e   : > { %v877_v38 = vmul.f32 %v876_v37, %v868_v29 }
 0x250   : > { %v878_v39 = vpack.c.bf16 %v877_v38, %v877_v38 }
 0x252   : > { %879 = vst [vmem:[#allocation3] sm:$0xf] %v878_v39 }
 0x253 PF: > { %s3007_s12 = sld [smem:[#allocation28_spill]] }
 0x259   : > { %p1616_p4 = scmp.lt.s32.totalorder %s3007_s12, 4 }
 0x25a   : > { %v1911_v40 = vld [vmem:[%s2758_s10 + $0x4] ss:$8 sps:$4 sm:$0xff] (!%p1616_p4)   ;;  %v1913_v41 = vld [vmem:[%s2758_s10] ss:$8 sps:$4 sm:$0xff] (!%p1616_p4)   ;;  %v2301_v42 = vmov (!%p1616_p4), 0   ;;  %v1939_v62 = vld [vmem:[%s2771_s25 + $0x50] sm:$0xff] (!%p1616_p4)   ;;  %v906_v10 = vlaneseq (!%p1616_p4) }
 0x25b   : > { %883 = sbr.rel (%p1616_p4) target bundleno = 1090 (0x442), region = 96  ;;  %1028 = vmatprep.mubr.bf16.mxu0 (!%p1616_p4), %v2301_v42  ;;  %996 = vmatprep.subr.bf16.mxu0 (!%p1616_p4), %v1911_v40  ;;  %v1914_v43 = vld [vmem:[%s2758_s10 + $0x14] ss:$8 sps:$4 sm:$0xff] (!%p1616_p4)   ;;  %v1916_v44 = vld [vmem:[%s2758_s10 + $0x10] ss:$8 sps:$4 sm:$0xff] (!%p1616_p4)   ;;  %v1935_v50 = vld [vmem:[%s2771_s25 + $0x40] sm:$0xff] (!%p1616_p4)  }
 0x25c   : > { %997 = vmatpush1.bf16.msra.mxu0 (!%p1616_p4), %v1913_v41  ;;  %v1917_v45 = vld [vmem:[%s2758_s10 + $0x24] ss:$8 sps:$4 sm:$0xff] (!%p1616_p4)   ;;  %v1919_v46 = vld [vmem:[%s2758_s10 + $0x20] ss:$8 sps:$4 sm:$0xff] (!%p1616_p4)   ;;  %v1920_v47 = vld [vmem:[%s2758_s10 + $0x34] ss:$8 sps:$4 sm:$0xff] (!%p1616_p4)   ;;  %1690 = vmatprep.subr.bf16.mxu1 (!%p1616_p4), %v1935_v50 }
 0x25d   : > { %998 = vmatprep.subr.bf16.mxu0 (!%p1616_p4), %v1914_v43  ;;  %v1922_v48 = vld [vmem:[%s2758_s10 + $0x30] ss:$8 sps:$4 sm:$0xff] (!%p1616_p4)   ;;  %v1923_v49 = vld [vmem:[%s2758_s10 + $0x44] ss:$8 sps:$4 sm:$0xff] (!%p1616_p4)   ;;  %v1925_v52 = vld [vmem:[%s2758_s10 + $0x40] ss:$8 sps:$4 sm:$0xff] (!%p1616_p4)  }
 0x25e   : > { %v1936_v51 = vld [vmem:[%s2771_s25] sm:$0xff] (!%p1616_p4)   ;;  %v1937_v53 = vld [vmem:[%s2771_s25 + $0x48] sm:$0xff] (!%p1616_p4)   ;;  %v1926_v55 = vld [vmem:[%s2758_s10 + $0x54] ss:$8 sps:$4 sm:$0xff] (!%p1616_p4)   ;;  %v907_v11 = vshrl.u32 (!%p1616_p4), %v906_v10, 7  ;;  %s1039_s0 = sld [smem:[#allocation5]] (!%p1616_p4) }
 0x25f   : > { %1691 = vmatpush3.bf16.msra.mxu1 (!%p1616_p4), %v1936_v51  ;;  %v1938_v54 = vld [vmem:[%s2771_s25 + $0x8] sm:$0xff] (!%p1616_p4)   ;;  %v1931_v58 = vld [vmem:[%s2758_s10 + $0x60] ss:$8 sps:$4 sm:$0xff] (!%p1616_p4)   ;;  %v1932_v59 = vld [vmem:[%s2758_s10 + $0x74] ss:$8 sps:$4 sm:$0xff] (!%p1616_p4)  }
 0x260   : > { %999 = vmatpush1.bf16.msra.mxu0 (!%p1616_p4), %v1916_v44  ;;  %1692 = vmatprep.subr.bf16.mxu1 (!%p1616_p4), %v1937_v53  ;;  %v1928_v56 = vld [vmem:[%s2758_s10 + $0x50] ss:$8 sps:$4 sm:$0xff] (!%p1616_p4)   ;;  %v1929_v57 = vld [vmem:[%s2758_s10 + $0x64] ss:$8 sps:$4 sm:$0xff] (!%p1616_p4)   ;;  %v1941_v0 = vld [vmem:[%s2771_s25 + $0x58] sm:$0xff] (!%p1616_p4)   ;;  %v908_v12 = vsub.s32 (!%p1616_p4), 0, %v907_v11 }
 0x261   : > { %1000 = vmatprep.subr.bf16.mxu0 (!%p1616_p4), %v1917_v45  ;;  %v1934_v60 = vld [vmem:[%s2758_s10 + $0x70] ss:$8 sps:$4 sm:$0xff] (!%p1616_p4)   ;;  %v887_v61 = vld [vmem:[#allocation3] sm:$0xf] (!%p1616_p4)  ;;  %v1942_v1 = vld [vmem:[%s2771_s25 + $0x18] sm:$0xff] (!%p1616_p4)   ;;  %v912_v14 = vsub.s32 (!%p1616_p4), 1, %v907_v11 }
 0x262   : > { %v1940_v63 = vld [vmem:[%s2771_s25 + $0x10] sm:$0xff]   ;;  %v1943_v2 = vld [vmem:[%s2771_s25 + $0x60] sm:$0xff]   ;;  %v1945_v4 = vld [vmem:[%s2771_s25 + $0x68] sm:$0xff]  }
 0x263   : > { %1693 = vmatpush3.bf16.msra.mxu1 %v1938_v54  ;;  %v1944_v3 = vld [vmem:[%s2771_s25 + $0x20] sm:$0xff]   ;;  %v1946_v5 = vld [vmem:[%s2771_s25 + $0x28] sm:$0xff]   ;;  %v1947_v6 = vld [vmem:[%s2771_s25 + $0x70] sm:$0xff]  }
 0x264   : > { %1001 = vmatpush1.bf16.msra.mxu0 %v1919_v46  ;;  %1694 = vmatprep.subr.bf16.mxu1 %v1939_v62  ;;  %v1948_v7 = vld [vmem:[%s2771_s25 + $0x30] sm:$0xff]   ;;  %v1949_v8 = vld [vmem:[%s2771_s25 + $0x78] sm:$0xff]   ;;  %v1040_v24 = vstv %s1039_s0  ;;  %v1074_v46 = vld [vmem:[#allocation4] sm:$0xff] }
 0x265   : > { %1002 = vmatprep.subr.bf16.mxu0 %v1920_v47  ;;  %v1950_v9 = vld [vmem:[%s2771_s25 + $0x38] sm:$0xff]  }
 0x266   : > { %v904_v13 = vld [vmem:[%s555_s24] sm:$0x3]  ;;  %v884_v23 = vld [vmem:[%s528_s27] sm:$0xff] }
 0x267   : > { %1695 = vmatpush3.bf16.msra.mxu1 %v1940_v63  ;;  %v909_v15 = vrot.slane %v904_v13, %v908_v12  ;;  %v913_v16 = vrot.slane %v904_v13, %v912_v14  ;;  %v1045_v25 = vld [vmem:[%s2781_s29] ss:$2 sm:$0x3]  ;;  %v885_v26 = vunpack.c.l.bf16 %v884_v23  ;;  %v886_v28 = vunpack.c.h.bf16 %v884_v23  ;;  %v1633_v29 = vld [vmem:[%s2781_s29 + $0x1] ss:$2 sm:$0x3] }
 0x268   : > { %1003 = vmatpush1.bf16.msra.mxu0 %v1922_v48  ;;  %1696 = vmatprep.subr.bf16.mxu1 %v1941_v0  ;;  %v1052_v32 = vrot.slane %v1045_v25, %v908_v12  ;;  %v1056_v34 = vrot.slane %v1045_v25, %v912_v14  ;;  %v1065_v35 = vrot.slane %v1633_v29, %v908_v12 }
 0x269   : > { %1004 = vmatprep.subr.bf16.mxu0 %v1923_v49  ;;  %v1069_v38 = vrot.slane %v1633_v29, %v912_v14 }
 0x26b   : > { %1697 = vmatpush3.bf16.msra.mxu1 %v1942_v1 }
 0x26c   : > { %1005 = vmatpush1.bf16.msra.mxu0 %v1925_v52  ;;  %1698 = vmatprep.subr.bf16.mxu1 %v1943_v2 }
 0x26d   : > { %1006 = vmatprep.subr.bf16.mxu0 %v1926_v55 }
 0x26f   : > { %1699 = vmatpush3.bf16.msra.mxu1 %v1944_v3 }
 0x270   : > { %1007 = vmatpush1.bf16.msra.mxu0 %v1928_v56  ;;  %1700 = vmatprep.subr.bf16.mxu1 %v1945_v4 }
 0x271   : > { %1008 = vmatprep.subr.bf16.mxu0 %v1929_v57 }
 0x273   : > { %1701 = vmatpush3.bf16.msra.mxu1 %v1946_v5 }
 0x274   : > { %1009 = vmatpush1.bf16.msra.mxu0 %v1931_v58  ;;  %1702 = vmatprep.subr.bf16.mxu1 %v1947_v6 }
 0x275   : > { %1010 = vmatprep.subr.bf16.mxu0 %v1932_v59 }
 0x277   : > { %1703 = vmatpush3.bf16.msra.mxu1 %v1948_v7 }
 0x278   : > { %1011 = vmatpush1.bf16.msra.mxu0 %v1934_v60  ;;  %1704 = vmatprep.subr.bf16.mxu1 %v1949_v8 }
 0x27b   : > { %1029 = vmatmul.mubr.bf16.vlgmr.msra.gmra.mrb[0].mxu0 %v887_v61  ;;  %1705 = vmatpush3.bf16.msra.mxu1 %v1950_v9 }
 0x34e   : > { %v1030_v17 = vpop.f32.mrb[0].mxu0 }
 0x34f   : > { %v1031_v18 = vadd.f32 %v1030_v17, %v909_v15  ;;  %v1032_v19 = vpop.f32.mrb[1].mxu0 }
 0x350   : > { %v1033_v20 = vadd.f32 %v1032_v19, %v913_v16  ;;  %v1034_v21 = vpop.f32.mrb[2].mxu0 }
 0x351   : > { %1951 = vtanh.f32 %v1031_v18  ;;  %v1035_v22 = vpop.f32.mrb[3].mxu0 }
 0x352   : > { %1953 = vtanh.f32 %v1033_v20 }
 0x35b   : > { %v1952_v27 = vpop.eup %1951 }
 0x35c   : > { %v1954_v30 = vpop.eup %1953  ;;  %v1041_v31 = vmul.f32 %v1952_v27, %v1040_v24 }
 0x35d   : > { %v1042_v33 = vmul.f32 %v1954_v30, %v1040_v24 }
 0x35e   : > { %v1043_v36 = vadd.f32 %v1041_v31, %v885_v26 }
 0x35f   : > { %v1044_v37 = vadd.f32 %v1042_v33, %v886_v28 }
 0x360   : > { %v1059_v39 = vmax.f32 %v1052_v32, %v1043_v36 }
 0x361   : > { %v1060_v40 = vmax.f32 %v1056_v34, %v1044_v37 }
 0x362   : > { %v1072_v41 = vmin.f32 %v1065_v35, %v1059_v39 }
 0x363   : > { %v1073_v42 = vmin.f32 %v1069_v38, %v1060_v40 }
 0x364   : > { %v1075_v44 = vpack.c.bf16 %v1072_v41, %v1072_v41 }
 0x365   : > { %v1076_v43 = vpack.c.bf16 %v1073_v42, %v1073_v42 }
 0x367   : > { %1237 = vmatprep.mubr.bf16.mxu1 %v1076_v43 }
 0x368   : > { %1238 = vmatmul.mubr.bf16.vlgmr.msra.gmra.mrb[0].mxu1 %v1075_v44 }
 0x43b   : > { %v1706_v45 = vpop.f32.mrb[0].mxu1 }
 0x43c   : > { %v1707_v47 = vpop.f32.mrb[1].mxu1 }
 0x43d   : > { %v1708_v48 = vadd.f32 %v1707_v47, %v1706_v45  ;;  %v1709_v49 = vpop.f32.mrb[2].mxu1 }
 0x43e   : > { %v1710_v50 = vpop.f32.mrb[3].mxu1 }
 0x43f   : > { %v1245_v51 = vadd.f32 %v1708_v48, %v1074_v46 }
 0x441   : > { %1246 = vst [vmem:[#allocation4] sm:$0xff] %v1245_v51 }
 0x442 PF: > { %s3008_s9 = sld [smem:[#allocation28_spill]] }
 0x448   : > { %p1650_p5 = scmp.ne.s32.totalorder %s3008_s9, 7 }
 0x449   : > { %v1251_v52 = vld [vmem:[#allocation4] sm:$0xff] (!%p1650_p5)  ;;  %v2302_v54 = vmov (!%p1650_p5), 0.0   ;;  %v1957_v57 = vld [vmem:[#allocation15 + $0x10] sm:$0xff] (!%p1650_p5)   ;;  %v1958_v58 = vld [vmem:[#allocation15 + $0x18] sm:$0xff] (!%p1650_p5)   ;;  %vm2303_vm0 = vmmov (!%p1650_p5), 0  }
 0x44a   : > { %1250 = sbr.rel (%p1650_p5) target bundleno = 1474 (0x5c2), region = 100  ;;  %v1252_v53 = vmul.f32 (!%p1650_p5), %v1251_v52, %v1251_v52  ;;  %1721 = vmatprep.subr.bf16.mxu0 (!%p1650_p5), %v2302_v54  ;;  %v1955_v55 = vld [vmem:[#allocation15] sm:$0xff] (!%p1650_p5)   ;;  %v1956_v56 = vld [vmem:[#allocation15 + $0x8] sm:$0xff] (!%p1650_p5)   ;;  %1737 = vmatprep.mubr.msk.bf16.mxu0 (!%p1650_p5), %vm2303_vm0, %v2302_v54  ;;  %v1961_v61 = vld [vmem:[#allocation15 + $0x30] sm:$0xff] (!%p1650_p5)  }
 0x44b   : > { %1722 = vmatpush3.bf16.msra.mxu0 (!%p1650_p5), %v1955_v55  ;;  %v1959_v59 = vld [vmem:[#allocation15 + $0x20] sm:$0xff] (!%p1650_p5)   ;;  %v1960_v60 = vld [vmem:[#allocation15 + $0x28] sm:$0xff] (!%p1650_p5)   ;;  %v1962_v62 = vld [vmem:[#allocation15 + $0x38] sm:$0xff] (!%p1650_p5)  }
 0x44c   : > { %1253 = vadd.xlane.f32.xlu0 (!%p1650_p5), %v1252_v53  ;;  %1723 = vmatprep.subr.bf16.mxu0 (!%p1650_p5), %v2302_v54 }
 0x44f   : > { %1724 = vmatpush3.bf16.msra.mxu0 (!%p1650_p5), %v1956_v56 }
 0x450   : > { %1725 = vmatprep.subr.bf16.mxu0 (!%p1650_p5), %v2302_v54 }
 0x453   : > { %1726 = vmatpush3.bf16.msra.mxu0 %v1957_v57 }
 0x454   : > { %1727 = vmatprep.subr.bf16.mxu0 %v2302_v54 }
 0x457   : > { %1728 = vmatpush3.bf16.msra.mxu0 %v1958_v58 }
 0x458   : > { %1729 = vmatprep.subr.bf16.mxu0 %v2302_v54 }
 0x45b   : > { %1730 = vmatpush3.bf16.msra.mxu0 %v1959_v59 }
 0x45c   : > { %1731 = vmatprep.subr.bf16.mxu0 %v2302_v54 }
 0x45f   : > { %1732 = vmatpush3.bf16.msra.mxu0 %v1960_v60 }
 0x460   : > { %1733 = vmatprep.subr.bf16.mxu0 %v2302_v54 }
 0x463   : > { %1734 = vmatpush3.bf16.msra.mxu0 %v1961_v61 }
 0x464   : > { %1735 = vmatprep.subr.bf16.mxu0 %v2302_v54 }
 0x467   : > { %1736 = vmatpush3.bf16.msra.mxu0 %v1962_v62 }
 0x4d9   : > { %v1254_v63 = vpop.xlane.xlu0 %1253 }
 0x4da   : > { %v1255_v0 = vadd.f32 1e-12, %v1254_v63 }
 0x4dc   : > { %1963 = vrsqrt.f32 %v1255_v0 }
 0x4e6   : > { %v1964_v1 = vpop.eup %1963 }
 0x4e7   : > { %v1257_v2 = vmul.f32 %v1964_v1, %v1251_v52 }
 0x4e9   : > { %v1258_v3 = vpack.c.bf16 %v1257_v2, %v1257_v2 }
 0x4eb   : > { %1738 = vmatmul.mubr.bf16.vlgmr.msra.gmra.mrb[0].mxu0 %v1258_v3 }
 0x5be   : > { %v1357_v4 = vpop.f32.mrb[0].mxu0 }
 0x5bf   : > { %1363 = vst [vmem:[#allocation17] sm:$0xff] %v1357_v4  ;;  %v1739_v5 = vpop.f32.mrb[1].mxu0 }
 0x5c0   : > { %v1360_v6 = vpop.f32.mrb[2].mxu0 }
 0x5c1   : > { %v1740_v7 = vpop.f32.mrb[3].mxu0 }
 0x5c2 PF: > { %p1782_p3 = scmp.eq.s32.totalorder %s2492_s23, 7  ;;  %s2304_s27 = smov [#allocation17]  }
 0x5c3   : > { %s1373_s22 = sshll.u32 %s2304_s27, 4  ;;  %s1374_s22 = int_to_ptr.vmem [resolvable:$true] %s1373_s22 }
 0x5c4   : > { %s2143_s10 = scalar_lea.vmem %s1374_s22, 128  ;;  %p2150_p11 = scmp.lt.s32.totalorder %s1374_s22, %s1374_s22 }
 0x5c5   : > { %p2144_p1 = scmp.ne.s32.totalorder %s1374_s22, %s2143_s10  ;;  %p2151_p0 = scmp.lt.s32.totalorder %s2143_s10, %s2143_s10 }
 0x5c7   : > { %p2145_p7 = pnand %p2144_p1, %p1782_p3  ;;  %p2152_p10 = por %p2151_p0, %p2150_p11 }
 0x5c9   : > { %p2146_p8 = pneg %p2145_p7 }
 0x5cb   : > { %p2153_p12 = pnand %p2152_p10, %p2146_p8 }
 0x5cd   : > { %2156 = shalt.err (!%p2153_p12)
}
 0x5ce   : > { %s3009_s24 = sld [smem:[#allocation42_spill]] }
 0x5d4   : > { %s2157_s25 = scalar_lea.hbm %s3009_s24, 128 }
 0x5d5   : > { %p2158_p6 = scmp.ne.s32.totalorder %s3009_s24, %s2157_s25  ;;  %p2163_p13 = scmp.lt.u32.totalorder %s2157_s25, %s3009_s24 }
 0x5d7   : > { %p2159_p9 = pnand %p2158_p6, %p1782_p3 }
 0x5d9   : > { %p2160_p2 = pneg %p2159_p9 }
 0x5db   : > { %p2165_p4 = pnand %p2163_p13, %p2160_p2 }
 0x5dd   : > { %2168 = shalt.err (!%p2165_p4)
}
 0x5de   : > { %1756 = dma.vmem_to_hbm [thread:$0]  (%p1782_p3), %s1374_s22, 128, %s3009_s24, [#allocation8]  }
 0x5df   : > { %2238 = dma.done.wait (%p1782_p3), [#allocation8], 128  }
 0x5e0   : > { %2240 = vsyncadd (%p1782_p3), [#allocation8], 4294967168 }
 0x5e1 PF: > { %s31_s21 = sadd.s32 1, %s2287_s21   ;;  %s3010_s20 = sld [smem:[#allocation24_spill]] }
 0x5e2   : > { %p28_p5 = scmp.ge.s32.totalorder %s31_s21, 10   ;;  %s3011_s12 = sld [smem:[#allocation25_spill]] }
 0x5e3   : > { %s3012_s13 = sld [smem:[#allocation34_spill]]  ;;  %s3013_s14 = sld [smem:[#allocation26_spill]] }
 0x5e4   : > { %s3014_s15 = sld [smem:[#allocation27_spill]]  ;;  %s3015_s16 = sld [smem:[#allocation31_spill]] }
 0x5e5   : > { %s3016_s29 = smov %s2649_s11  ;;  %s3017_s19 = sld [smem:[#allocation29_spill]] }
 0x5e6   : > { %s3018_s2 = sld [smem:[#allocation30_spill]]  ;;  %s3020_s0 = smov %s2271_s17 }
 0x5e7   : > { %s3019_s11 = smov %s3010_s20  ;;  %s3021_s17 = smov %s2275_s18 }
 0x5e8   : > { %s3022_s18 = smov %s3016_s29  ;;  %30 = sbr.rel (!%p28_p5) target bundleno = 23 (0x17), region = 170 }
 0x5ec   : > { %s3023_s20 = smov %s3018_s2 }
 0x5ef   :  { %1386 = vsyncpa [#allocation7], 1 }
 0x5f0   :  { %1388 = vsyncpa [#allocation7 + $0x1], 1 }
 0x5f1   :  { %1389 = vsyncpa [#allocation10], 1 }
 0x5f2   :  { %1391 = vsyncpa [#allocation10 + $0x1], 1 }
 0x5f3   :  { %1392 = vsyncpa [#allocation13], 1 }
 0x5f4   :  { %1394 = vsyncpa [#allocation13 + $0x1], 1 }
 0x5f5   :  { %1395 = vsyncpa [#allocation16], 1 }
 0x5f6   :  { %1396 = vsyncpa [#allocation8], 1 }
 0x5f7   :  { %1398 = vsyncpa [#allocation8 + $0x1], 1 }

// kernel: tpu_custom_call.1
= control target key start
LH: loop header
LB: loop body
LE: loop exit
PB: predicated region body
PF: predicated region fallthrough
CT: control target
= control target key end

     0   :  { %s2906_s0 = inlined_call_operand.<no memory space> [shape: f32[1], index: 0, kind: input, shape index: {}]   ;;  %s2907_s1 = inlined_call_operand.hbm [shape: bf16[8,1024], index: 1, kind: input, shape index: {}]   ;;  %s2908_s2 = inlined_call_operand.hbm [shape: bf16[1024,128], index: 2, kind: input, shape index: {}]   ;;  %s2909_s3 = inlined_call_operand.vmem [shape: f32[1,128], index: 3, kind: input, shape index: {}]   ;;  %s2910_s4 = inlined_call_operand.hbm [shape: bf16[128,1024], index: 4, kind: input, shape index: {}]   ;;  %s2911_s5 = inlined_call_operand.hbm [shape: f32[1,1024], index: 5, kind: input, shape index: {}]   ;;  %s2912_s6 = inlined_call_operand.vmem [shape: f32[2,1024], index: 6, kind: input, shape index: {}]   ;;  %s2913_s7 = inlined_call_operand.hbm [shape: bf16[1024,128], index: 7, kind: input, shape index: {}]   ;;  %s2914_s8 = inlined_call_operand.hbm [shape: bf16[128,128], index: 8, kind: input, shape index: {}]   ;;  %s2915_s9 = inlined_call_operand.hbm [shape: f32[8,128], index: 9, kind: output, shape index: {}]  }
   0x1   :  { %2946 = sst [smem:[#allocation35_spill]] %s2908_s2 }
   0x2   :  { %2947 = sst [smem:[#allocation36_spill]] %s2909_s3 }
   0x3   :  { %2948 = sst [smem:[#allocation37_spill]] %s2910_s4 }
   0x4   :  { %2949 = sst [smem:[#allocation38_spill]] %s2911_s5 }
   0x5   :  { %2950 = sst [smem:[#allocation39_spill]] %s2912_s6 }
   0x6   :  { %2951 = sst [smem:[#allocation40_spill]] %s2913_s7 }
   0x7   :  { %2952 = sst [smem:[#allocation41_spill]] %s2914_s8 }
   0x8   :  { %2953 = sst [smem:[#allocation42_spill]] %s2915_s9 }
   0x9   :  { %14 = sst [smem:[#allocation5]] %s2906_s0 }
   0xa   :  { %15 = vsyncpa [#allocation7], 0 }
   0xb   :  { %17 = vsyncpa [#allocation7 + $0x1], 0 }
   0xc   :  { %18 = vsyncpa [#allocation10], 0 }
   0xd   :  { %20 = vsyncpa [#allocation10 + $0x1], 0 }
   0xe   :  { %21 = vsyncpa [#allocation13], 0 }
   0xf   :  { %23 = vsyncpa [#allocation13 + $0x1], 0 }
  0x10   :  { %24 = vsyncpa [#allocation16], 0 }
  0x11   :  { %25 = vsyncpa [#allocation8], 0  ;;  %s2358_s11 = smov 0   ;;  %s2360_s12 = smov 0  }
  0x12   :  { %s2362_s13 = smov 0   ;;  %s2364_s14 = smov 0  }
  0x13   :  { %s2366_s15 = smov 0   ;;  %s2368_s16 = smov 0  }
  0x14   :  { %s2370_s0 = smov 0   ;;  %s2372_s17 = smov 0  }
  0x15   :  { %s2374_s18 = smov 0   ;;  %s2376_s19 = smov 0  }
  0x16   :  { %s2378_s20 = smov 0   ;;  %s2380_s21 = smov 0  }
  0x17 LB: > { %2954 = sst [smem:[#allocation24_spill]] %s2247_s12  ;;  %s40_s22 = sadd.s32 1, %s2283_s20  ;;  %s2287_s21 = sphi %s2380_s21, %s31_s21   ;;  %s2283_s20 = sphi %s2378_s20, %s3023_s20   ;;  %s2279_s19 = sphi %s2376_s19, %s3017_s19   ;;  %s2275_s18 = sphi %s2374_s18, %s3022_s18   ;;  %s2271_s17 = sphi %s2372_s17, %s3021_s17   ;;  %s2267_s0 = sphi %s2370_s0, %s3020_s0   ;;  %s2263_s16 = sphi %s2368_s16, %s3015_s16   ;;  %s2259_s15 = sphi %s2366_s15, %s3014_s15   ;;  %s2255_s14 = sphi %s2364_s14, %s3013_s14   ;;  %s2251_s13 = sphi %s2362_s13, %s3012_s13   ;;  %s2247_s12 = sphi %s2360_s12, %s3011_s12   ;;  %s2243_s11 = sphi %s2358_s11, %s3019_s11  }
  0x18   : > { %2955 = sst [smem:[#allocation25_spill]] %s2251_s13  ;;  %p2921_p0 = scmp.eq.s32.totalorder %s2287_s21, 0 }
  0x19   : > { %2956 = sst [smem:[#allocation26_spill]] %s2259_s15  ;;  %p41_p1 = scmp.ge.s32.totalorder %s40_s22, 8 }
  0x1a   : > { %2957 = sst [smem:[#allocation27_spill]] %s2263_s16  ;;  %p120_p2 = scmp.lt.s32.totalorder %s2283_s20, 3 }
  0x1b   : > { %2958 = sst [smem:[#allocation28_spill]] %s2279_s19  ;;  %s127_s23 = sadd.s32 1, %s2263_s16 }
  0x1c   : > { %2959 = sst [smem:[#allocation29_spill]] %s2283_s20  ;;  %p134_p3 = scmp.ne.s32.totalorder %s2263_s16, %s2259_s15 }
  0x1d   : > { %s3025_s22 = smov (%p41_p1, %s40_s22), 0  ;;  %p140_p6 = scmp.ne.s32.totalorder %s2259_s15, %s2255_s14 }
  0x1e   : > { %2960 = sst [smem:[#allocation30_spill]] %s3025_s22  ;;  %p122_p4 = scmp.lt.s32.totalorder %s3025_s22, 3 }
  0x1f   : > { %s121_s24 = scalar_select %p120_p2, %s2283_s20, 3 }
  0x20   : > { %p2430_p5 = por %p134_p3, %p2921_p0  ;;  %p2920_p7 = scmp.lt.s32.totalorder %s2287_s21, 8 }
  0x21   : > { %s123_s26 = scalar_select %p122_p4, %s3025_s22, 3 }
  0x22   : > { %s2926_s28 = sand.u32 1, %s2287_s21   ;;  %s414_s29 = sand.u32 1, %s2263_s16  }
  0x23   : > { %s124_s27 = ssub.s32 %s121_s24, %s123_s26  ;;  %s1569_s10 = sshll.u32 %s414_s29, 7 }
  0x24   : > { %p125_p8 = scmp.eq.s32.totalorder %s124_s27, 0  ;;  %s1664_s9 = sshll.u32 %s121_s24, 11 }
  0x25   : > { %s2963_s2 = sld [smem:[#allocation35_spill]]  ;;  %s416_s7 = scalar_lea.vmem [#allocation9], %s1569_s10 }
  0x26   : > { %s2441_s30 = scalar_select %p125_p8, %s2263_s16, %s127_s23  }
  0x27   : > { %s425_s4 = sshll.u32 %s416_s7, 4  ;;  %p2452_p9 = pnand %p2920_p7, %p2430_p5  ;;  %s2456_s4 = int_to_ptr.vmem [resolvable:$true] %s425_s4 }
  0x28   : > { %2962 = sst [smem:[#allocation31_spill]] %s2441_s30  ;;  %s2460_s3 = scalar_lea.sflag [#allocation10], %s2926_s28 }
  0x29   : > { %p1967_p11 = pneg %p2452_p9 }
  0x2b   : > { %s2446_s19 = scalar_lea.hbm %s2963_s2, %s1664_s9  ;;  %s1970_s23 = scalar_lea.hbm %s2963_s2, 8192 }
  0x2c   : > { %s1965_s6 = scalar_lea.hbm %s2446_s19, 2048  ;;  %p1971_p1 = scmp.lt.u32.totalorder %s2446_s19, %s2963_s2 }
  0x2d   : > { %p1966_p10 = scmp.ne.s32.totalorder %s2446_s19, %s1965_s6  ;;  %p1972_p2 = scmp.lt.u32.totalorder %s1970_s23, %s1965_s6 }
  0x2e   : > { %p1974_p4 = scmp.lt.u32.totalorder %s1965_s6, %s2446_s19 }
  0x2f   : > { %p1968_p12 = pnand %p1967_p11, %p1966_p10  ;;  %p1973_p3 = por %p1972_p2, %p1971_p1 }
  0x31   : > { %p1969_p13 = pneg %p1968_p12  ;;  %p1975_p5 = por %p1974_p4, %p1973_p3 }
  0x33   : > { %p1976_p8 = pnand %p1975_p5, %p1969_p13 }
  0x35   : > { %1979 = shalt.err (!%p1976_p8)
}
  0x36   : > { %s1980_s27 = scalar_lea.vmem %s2456_s4, 2048  ;;  %s2289_s29 = smov [#allocation9]  }
  0x37   : > { %p1981_p10 = scmp.ne.s32.totalorder %s2456_s4, %s1980_s27  ;;  %s1985_s10 = sshll.u32 %s2289_s29, 4  ;;  %s1986_s10 = int_to_ptr.vmem [resolvable:$false] %s1985_s10 }
  0x38   : > { %s1987_s7 = scalar_lea.vmem %s1986_s10, 4096  ;;  %p1988_p0 = scmp.lt.s32.totalorder %s2456_s4, %s1986_s10 }
  0x39   : > { %p1983_p12 = pnand %p1981_p10, %p1967_p11  ;;  %p1989_p1 = scmp.lt.s32.totalorder %s1987_s7, %s1980_s27 }
  0x3b   : > { %p1984_p7 = pneg %p1983_p12  ;;  %p1990_p2 = por %p1989_p1, %p1988_p0 }
  0x3d   : > { %p1991_p3 = pnand %p1990_p2, %p1984_p7 }
  0x3f   : > { %1994 = shalt.err (!%p1991_p3)
}
  0x40   : > { %s2922_s6 = smov 64   ;;  %s2924_s9 = smov 4  }
  0x41   : > { %1769 = dma.hbm_to_vmem [thread:$0]  (!%p2452_p9), %s2446_s19, 2048, %s2456_s4, %s2460_s3, %s2922_s6, %s2922_s6, %s2924_s9  }
  0x42   : > { %s2492_s23 = sadd.s32 4294967295, %s2287_s21   ;;  %s1552_s24 = sadd.s32 4294967292, %s2283_s20 }
  0x43   : > { %p2928_p0 = scmp.eq.s32.totalorder %s2492_s23, 0  ;;  %p172_p7 = scmp.gt.s32.totalorder %s1552_s24, 0 }
  0x44   : > { %s1553_s25 = sadd.s32 4294967292, %s3025_s22  ;;  %s180_s27 = sadd.s32 1, %s2251_s13 }
  0x45   : > { %p2503_p11 = por %p140_p6, %p2928_p0  ;;  %p175_p9 = scmp.gt.s32.totalorder %s1553_s25, 0 }
  0x46   : > { %s3027_s24 = smov (!%p172_p7, %s1552_s24), 0  ;;  %p187_p13 = scmp.ne.s32.totalorder %s2251_s13, %s2247_s12 }
  0x47   : > { %s2965_s26 = scalar_select %p2503_p11, 1, 0 }
  0x48   : > { %s3029_s25 = smov (!%p175_p9, %s1553_s25), 0  ;;  %p193_p4 = scmp.ne.s32.totalorder %s2247_s12, %s2243_s11 }
  0x49   : > { %2966 = sst [smem:[#allocation32_spill]] %s2965_s26  ;;  %s177_s4 = ssub.s32 %s3027_s24, %s3029_s25 }
  0x4a   : > { %p178_p5 = scmp.eq.s32.totalorder %s177_s4, 0  ;;  %p2967_p8 = scmp.eq.s32.totalorder %s2287_s21, 0 }
  0x4b   : > { %p2518_p12 = por %p193_p4, %p2928_p0  ;;  %s437_s19 = sand.u32 1, %s2251_s13  }
  0x4c   : > { %p189_p10 = por %p187_p13, %p2967_p8  ;;  %s2526_s10 = sshll.u32 %s437_s19, 7 }
  0x4d   : > { %s2968_s14 = scalar_select %p2518_p12, 1, 0 }
  0x4e   : > { %s2524_s29 = scalar_select %p178_p5, %s2251_s13, %s180_s27  }
  0x4f   : > { %2969 = sst [smem:[#allocation33_spill]] %s2968_s14  ;;  %p2971_p6 = scmp.lt.s32.totalorder %s2287_s21, 8 }
  0x50   : > { %2970 = sst [smem:[#allocation34_spill]] %s2524_s29  ;;  %s439_s11 = scalar_lea.vmem [#allocation11], %s2526_s10 }
  0x51   : > { %p2530_p1 = pnand %p2971_p6, %p189_p10  ;;  %s449_s25 = sshll.u32 %s439_s11, 4  ;;  %s2535_s25 = int_to_ptr.vmem [resolvable:$true] %s449_s25 }
  0x52   : > { %s1576_s4 = sshll.u32 %s437_s19, 1  ;;  %s1666_s6 = sshll.u32 %s3027_s24, 5 }
  0x53   : > { %s2972_s7 = scalar_select %p2530_p1, 1, 0 }
  0x54   : > { %s2973_s5 = sld [smem:[#allocation38_spill]]  ;;  %s463_s2 = scalar_lea.vmem [#allocation12], %s1576_s4 }
  0x55   : > { %s474_s30 = sshll.u32 %s463_s2, 4  ;;  %s2974_s16 = sand.u32 1, %s2287_s21   ;;  %s2543_s30 = int_to_ptr.vmem [resolvable:$true] %s474_s30 }
  0x56   : > { %s2547_s29 = scalar_lea.sflag [#allocation13], %s2974_s16  ;;  %p2553_p3 = pneg %p2530_p1 }
  0x58   : > { %s2975_s19 = scalar_select %p2553_p3, 1, 0 }
  0x5a   : > { %s2541_s27 = scalar_lea.hbm %s2973_s5, %s1666_s6  ;;  %s2000_s2 = scalar_lea.hbm %s2973_s5, 128 }
  0x5b   : > { %s1995_s11 = scalar_lea.hbm %s2541_s27, 32  ;;  %p2001_p13 = scmp.lt.u32.totalorder %s2541_s27, %s2973_s5 }
  0x5c   : > { %p1996_p2 = scmp.ne.s32.totalorder %s2541_s27, %s1995_s11  ;;  %p2002_p4 = scmp.lt.u32.totalorder %s2000_s2, %s1995_s11 }
  0x5d   : > { %p2004_p8 = scmp.lt.u32.totalorder %s1995_s11, %s2541_s27 }
  0x5e   : > { %p1998_p7 = pnand %p2553_p3, %p1996_p2  ;;  %p2003_p5 = por %p2002_p4, %p2001_p13 }
  0x60   : > { %p1999_p9 = pneg %p1998_p7  ;;  %p2005_p10 = por %p2004_p8, %p2003_p5 }
  0x62   : > { %p2006_p6 = pnand %p2005_p10, %p1999_p9 }
  0x64   : > { %2009 = shalt.err (!%p2006_p6)
}
  0x65   : > { %s2010_s16 = scalar_lea.vmem %s2543_s30, 32  ;;  %s2292_s28 = smov [#allocation12]  }
  0x66   : > { %p2011_p2 = scmp.ne.s32.totalorder %s2543_s30, %s2010_s16  ;;  %s2015_s6 = sshll.u32 %s2292_s28, 4  ;;  %s2016_s6 = int_to_ptr.vmem [resolvable:$false] %s2015_s6 }
  0x67   : > { %s2017_s9 = scalar_lea.vmem %s2016_s6, 64  ;;  %p2018_p12 = scmp.lt.s32.totalorder %s2543_s30, %s2016_s6 }
  0x68   : > { %p2013_p7 = pnand %p2011_p2, %p2553_p3  ;;  %p2019_p11 = scmp.lt.s32.totalorder %s2017_s9, %s2010_s16 }
  0x6a   : > { %p2014_p0 = pneg %p2013_p7  ;;  %p2020_p13 = por %p2019_p11, %p2018_p12 }
  0x6c   : > { %p2021_p4 = pnand %p2020_p13, %p2014_p0 }
  0x6e   : > { %2024 = shalt.err (!%p2021_p4)
}
  0x6f   : > { %1775 = dma.hbm_to_vmem [thread:$0]  (!%p2530_p1), %s2541_s27, 32, %s2543_s30, %s2547_s29  }
  0x70   : > { %s500_s11 = scalar_lea.vmem [#allocation14], %s2526_s10  ;;  %p1560_p9 = scmp.ge.s32.totalorder %s2287_s21, 1 }
  0x71   : > { %s510_s2 = sshll.u32 %s500_s11, 4  ;;  %p347_p11 = scmp.lt.s32.totalorder %s2287_s21, 9  ;;  %s2578_s2 = int_to_ptr.vmem [resolvable:$true] %s510_s2 }
  0x72   : > { %s2293_s16 = smov [#allocation15]   ;;  %p2977_p5 = scmp.eq.s32.totalorder %s2492_s23, 0 }
  0x73   : > { %p2582_p0 = pnand %p1560_p9, %p347_p11  ;;  %s365_s28 = sshll.u32 %s2293_s16, 4  ;;  %s366_s28 = int_to_ptr.vmem [resolvable:$true] %s365_s28 }
  0x74   : > { %s69_s30 = ssub.s32 0, %s2283_s20  ;;  %s2979_s8 = sld [smem:[#allocation41_spill]] }
  0x75   : > { %s2976_s4 = scalar_select %p2582_p0, 1, 0 }
  0x76   : > { %p1759_p12 = pneg %p2582_p0  ;;  %s1546_s10 = smin.u32 %s2283_s20, %s69_s30 }
  0x78   : > { %p2590_p8 = pnand %p1759_p12, %p2977_p5 }
  0x7a   : > { %s2025_s11 = scalar_lea.hbm %s2979_s8, 1024  ;;  %p2027_p6 = pneg %p2590_p8 }
  0x7b   : > { %p2026_p10 = scmp.ne.s32.totalorder %s2979_s8, %s2025_s11  ;;  %p2032_p13 = scmp.lt.u32.totalorder %s2025_s11, %s2979_s8 }
  0x7d   : > { %p2028_p2 = pnand %p2027_p6, %p2026_p10 }
  0x7f   : > { %p2029_p7 = pneg %p2028_p2 }
  0x81   : > { %p2034_p4 = pnand %p2032_p13, %p2029_p7 }
  0x83   : > { %2037 = shalt.err (!%p2034_p4)
}
  0x84   : > { %s2038_s12 = scalar_lea.vmem %s366_s28, 1024  ;;  %p2046_p5 = scmp.lt.s32.totalorder %s366_s28, %s366_s28 }
  0x85   : > { %p2039_p9 = scmp.ne.s32.totalorder %s366_s28, %s2038_s12  ;;  %p2047_p0 = scmp.lt.s32.totalorder %s2038_s12, %s2038_s12 }
  0x87   : > { %p2041_p11 = pnand %p2039_p9, %p2027_p6  ;;  %p2048_p1 = por %p2047_p0, %p2046_p5 }
  0x89   : > { %p2042_p12 = pneg %p2041_p11 }
  0x8b   : > { %p2049_p3 = pnand %p2048_p1, %p2042_p12 }
  0x8d   : > { %2052 = shalt.err (!%p2049_p3)
}
  0x8e   : > { %s2980_s5 = smov 4   ;;  %s2981_s13 = smov 64  }
  0x8f   : > { %1762 = dma.hbm_to_vmem [thread:$0]  (!%p2590_p8), %s2979_s8, 1024, %s366_s28, [#allocation16], %s2981_s13, %s2981_s13, %s2980_s5  }
  0x90   : > { %s71_s12 = sand.u32 3, %s1546_s10   ;;  %s81_s14 = ssub.s32 0, %s3025_s22 }
  0x91   : > { %s1549_s6 = smin.u32 %s81_s14, %s3025_s22  ;;  %s97_s9 = sadd.s32 1, %s2275_s18 }
  0x92   : > { %p1548_p1 = scmp.lt.s32.totalorder %s71_s12, 0  ;;  %s78_s11 = sadd.s32 4, %s71_s12 }
  0x93   : > { %s83_s16 = sand.u32 3, %s1549_s6   ;;  %p104_p3 = scmp.ne.s32.totalorder %s2275_s18, %s2271_s17 }
  0x94   : > { %s3031_s11 = smov (!%p1548_p1, %s78_s11), %s71_s12  ;;  %p2982_p0 = scmp.eq.s32.totalorder %s2287_s21, 0 }
  0x95   : > { %p110_p6 = scmp.ne.s32.totalorder %s2271_s17, %s2267_s0  ;;  %s379_s27 = sand.u32 1, %s2275_s18  }
  0x96   : > { %p2622_p10 = por %p2982_p0, %p104_p3  ;;  %p1551_p8 = scmp.lt.s32.totalorder %s83_s16, 0 }
  0x97   : > { %s90_s28 = sadd.s32 4, %s83_s16  ;;  %p2984_p2 = scmp.eq.s32.totalorder %s2492_s23, 0 }
  0x98   : > { %s3033_s28 = smov (!%p1551_p8, %s90_s28), %s83_s16  ;;  %s1563_s14 = sshll.u32 %s379_s27, 3 }
  0x99   : > { %p2631_p7 = por %p2984_p2, %p110_p6  ;;  %s1663_s6 = sshll.u32 %s3031_s11, 7 }
  0x9a   : > { %s93_s12 = ssub.s32 %s3031_s11, %s3033_s28  ;;  %s2638_s20 = scalar_lea.hbm %s2907_s1, %s1663_s6 }
  0x9b   : > { %s2985_s10 = scalar_select %p2631_p7, 1, 0 }
  0x9c   : > { %p95_p13 = scmp.eq.s32.totalorder %s93_s12, 0  ;;  %s383_s0 = scalar_lea.vmem [#allocation6], %s1563_s14 }
  0x9d   : > { %s405_s26 = sshll.u32 %s383_s0, 4  ;;  %p2986_p4 = scmp.lt.s32.totalorder %s2287_s21, 8  ;;  %s2651_s26 = int_to_ptr.vmem [resolvable:$true] %s405_s26 }
  0x9e   : > { %s2649_s11 = scalar_select %p95_p13, %s2275_s18, %s97_s9  }
  0x9f   : > { %p2644_p9 = pnand %p2986_p4, %p2622_p10  ;;  %s380_s8 = scalar_lea.sflag [#allocation7], %s379_s27 }
  0xa0   : > { %s2053_s22 = scalar_lea.hbm %s2638_s20, 128  ;;  %s2058_s28 = scalar_lea.hbm %s2907_s1, 512 }
  0xa1   : > { %p2054_p11 = scmp.ne.s32.totalorder %s2638_s20, %s2053_s22  ;;  %p2055_p12 = pneg %p2644_p9 }
  0xa2   : > { %p2059_p3 = scmp.lt.u32.totalorder %s2638_s20, %s2907_s1  ;;  %p2060_p0 = scmp.lt.u32.totalorder %s2058_s28, %s2053_s22 }
  0xa3   : > { %p2056_p5 = pnand %p2055_p12, %p2054_p11  ;;  %p2062_p6 = scmp.lt.u32.totalorder %s2053_s22, %s2638_s20 }
  0xa4   : > { %p2061_p10 = por %p2060_p0, %p2059_p3 }
  0xa5   : > { %p2057_p1 = pneg %p2056_p5 }
  0xa6   : > { %p2063_p8 = por %p2062_p6, %p2061_p10 }
  0xa8   : > { %p2064_p2 = pnand %p2063_p8, %p2057_p1 }
  0xaa   : > { %2067 = shalt.err (!%p2064_p2)
}
  0xab   : > { %s2068_s9 = scalar_lea.vmem %s2651_s26, 128  ;;  %s2294_s27 = smov [#allocation6]  }
  0xac   : > { %p2069_p13 = scmp.ne.s32.totalorder %s2651_s26, %s2068_s9  ;;  %s2073_s12 = sshll.u32 %s2294_s27, 4  ;;  %s2074_s12 = int_to_ptr.vmem [resolvable:$false] %s2073_s12 }
  0xad   : > { %s2075_s0 = scalar_lea.vmem %s2074_s12, 256  ;;  %p2076_p5 = scmp.lt.s32.totalorder %s2651_s26, %s2074_s12 }
  0xae   : > { %p2071_p4 = pnand %p2069_p13, %p2055_p12  ;;  %p2077_p3 = scmp.lt.s32.totalorder %s2075_s0, %s2068_s9 }
  0xb0   : > { %p2072_p11 = pneg %p2071_p4  ;;  %p2078_p0 = por %p2077_p3, %p2076_p5 }
  0xb2   : > { %p2079_p10 = pnand %p2078_p0, %p2072_p11 }
  0xb4   : > { %2082 = shalt.err (!%p2079_p10)
}
  0xb5   : > { %1766 = dma.hbm_to_vmem [thread:$0]  (!%p2644_p9), %s2638_s20, 128, %s2651_s26, %s380_s8  }
  0xb6   : > { %s1665_s22 = sshll.u32 %s3027_s24, 7  ;;  %s2988_s28 = sld [smem:[#allocation37_spill]] }
  0xb7   : > { %s1667_s6 = sshll.u32 %s3027_s24, 11  ;;  %p2989_p1 = scmp.ne.s32.totalorder %s2975_s19, 0 }
  0xbc   : > { %s2682_s14 = scalar_lea.hbm %s2988_s28, %s1665_s22  ;;  %s2088_s20 = scalar_lea.hbm %s2988_s28, 8192 }
  0xbd   : > { %s2083_s9 = scalar_lea.hbm %s2682_s14, 2048  ;;  %p2089_p9 = scmp.lt.u32.totalorder %s2682_s14, %s2988_s28 }
  0xbe   : > { %p2084_p12 = scmp.ne.s32.totalorder %s2682_s14, %s2083_s9  ;;  %p2090_p2 = scmp.lt.u32.totalorder %s2088_s20, %s2083_s9 }
  0xbf   : > { %p2092_p4 = scmp.lt.u32.totalorder %s2083_s9, %s2682_s14 }
  0xc0   : > { %p2086_p6 = pnand %p2084_p12, %p2989_p1  ;;  %p2091_p13 = por %p2090_p2, %p2089_p9 }
  0xc2   : > { %p2087_p8 = pneg %p2086_p6  ;;  %p2093_p11 = por %p2092_p4, %p2091_p13 }
  0xc4   : > { %p2094_p5 = pnand %p2093_p11, %p2087_p8 }
  0xc6   : > { %2097 = shalt.err (!%p2094_p5)
}
  0xc7   : > { %s2098_s12 = scalar_lea.vmem %s2535_s25, 2048  ;;  %s2295_s0 = smov [#allocation11]  }
  0xc8   : > { %p2099_p3 = scmp.ne.s32.totalorder %s2535_s25, %s2098_s12  ;;  %s2103_s22 = sshll.u32 %s2295_s0, 4  ;;  %s2104_s22 = int_to_ptr.vmem [resolvable:$false] %s2103_s22 }
  0xc9   : > { %s2105_s16 = scalar_lea.vmem %s2104_s22, 4096  ;;  %p2106_p12 = scmp.lt.s32.totalorder %s2535_s25, %s2104_s22 }
  0xca   : > { %p2101_p0 = pnand %p2099_p3, %p2989_p1  ;;  %p2107_p6 = scmp.lt.s32.totalorder %s2105_s16, %s2098_s12 }
  0xcc   : > { %p2102_p10 = pneg %p2101_p0  ;;  %p2108_p9 = por %p2107_p6, %p2106_p12 }
  0xce   : > { %p2109_p2 = pnand %p2108_p9, %p2102_p10 }
  0xd0   : > { %2112 = shalt.err (!%p2109_p2)
}
  0xd1   : > { %s2296_s30 = smov 512   ;;  %s2297_s9 = smov 128  }
  0xd2   : > { %s2298_s15 = smov 8   ;;  %p2990_p8 = scmp.ne.s32.totalorder %s2972_s7, 0 }
  0xd3   : > { %s2991_s26 = sld [smem:[#allocation40_spill]] }
  0xd4   : > { %1772 = dma.hbm_to_vmem [thread:$0]  (!%p2990_p8), %s2682_s14, 2048, %s2535_s25, %s2460_s3, %s2296_s30, %s2297_s9, %s2298_s15  }
  0xd9   : > { %s2712_s8 = scalar_lea.hbm %s2991_s26, %s1667_s6  ;;  %s2118_s16 = scalar_lea.hbm %s2991_s26, 8192 }
  0xda   : > { %s2113_s12 = scalar_lea.hbm %s2712_s8, 2048  ;;  %p2119_p5 = scmp.lt.u32.totalorder %s2712_s8, %s2991_s26 }
  0xdb   : > { %p2114_p13 = scmp.ne.s32.totalorder %s2712_s8, %s2113_s12  ;;  %p2120_p3 = scmp.lt.u32.totalorder %s2118_s16, %s2113_s12 }
  0xdc   : > { %p2122_p10 = scmp.lt.u32.totalorder %s2113_s12, %s2712_s8 }
  0xdd   : > { %p2116_p4 = pnand %p2114_p13, %p2989_p1  ;;  %p2121_p0 = por %p2120_p3, %p2119_p5 }
  0xdf   : > { %p2117_p11 = pneg %p2116_p4  ;;  %p2123_p12 = por %p2122_p10, %p2121_p0 }
  0xe1   : > { %p2124_p6 = pnand %p2123_p12, %p2117_p11 }
  0xe3   : > { %2127 = shalt.err (!%p2124_p6)
}
  0xe4   : > { %s2128_s25 = scalar_lea.vmem %s2578_s2, 2048  ;;  %s2299_s14 = smov [#allocation14]  }
  0xe5   : > { %p2129_p9 = scmp.ne.s32.totalorder %s2578_s2, %s2128_s25  ;;  %s2133_s6 = sshll.u32 %s2299_s14, 4  ;;  %s2134_s6 = int_to_ptr.vmem [resolvable:$false] %s2133_s6 }
  0xe6   : > { %s2135_s30 = scalar_lea.vmem %s2134_s6, 4096  ;;  %p2136_p4 = scmp.lt.s32.totalorder %s2578_s2, %s2134_s6 }
  0xe7   : > { %p2131_p2 = pnand %p2129_p9, %p2989_p1  ;;  %p2137_p7 = scmp.lt.s32.totalorder %s2135_s30, %s2128_s25 }
  0xe9   : > { %p2132_p13 = pneg %p2131_p2  ;;  %p2138_p5 = por %p2137_p7, %p2136_p4 }
  0xeb   : > { %p2139_p3 = pnand %p2138_p5, %p2132_p13 }
  0xed   : > { %2142 = shalt.err (!%p2139_p3)
}
  0xee   : > { %1778 = dma.hbm_to_vmem [thread:$0]  (!%p2990_p8), %s2712_s8, 2048, %s2578_s2, %s2547_s29, %s2981_s13, %s2981_s13, %s2980_s5  }
  0xef   : > { %p2992_p1 = scmp.ne.s32.totalorder %s2976_s4, 0 }
  0xf0   : > { %s524_s19 = sand.u32 (!%p2992_p1), 1, %s2271_s17   ;;  %p2993_p7 = scmp.ne.s32.totalorder (!%p2992_p1), %s2985_s10, 0 }
  0xf1   : > { %522 = sbr.rel (%p2992_p1) target bundleno = 1505 (0x5e1), region = 56  ;;  %s2742_s9 = sshll.u32 (!%p2992_p1), %s524_s19, 3 }
  0xf2   : > { %s525_s15 = scalar_lea.sflag (!%p2992_p1), [#allocation7], %s524_s19  ;;  %s528_s27 = scalar_lea.vmem (!%p2992_p1), [#allocation6], %s2742_s9 }
  0xf8   : > { %2218 = dma.done.wait (%p2993_p7), %s525_s15, 128  }
  0xf9   : > { %2220 = vsyncadd (%p2993_p7), %s525_s15, 4294967168  ;;  %s2994_s7 = sld [smem:[#allocation26_spill]]  ;;  %s2995_s20 = sld [smem:[#allocation32_spill]] }
  0xfa   : > { %s533_s29 = sand.u32 1, %s2492_s23  }
  0xfb   : > { %s534_s5 = scalar_lea.sflag [#allocation10], %s533_s29 }
  0xff   : > { %s535_s2 = sand.u32 1, %s2994_s7   ;;  %p2996_p8 = scmp.ne.s32.totalorder %s2995_s20, 0 }
 0x100   : > { %s1586_s4 = sshll.u32 %s535_s2, 7 }
 0x101   : > { %s2751_s13 = scalar_lea.vmem [#allocation9], %s1586_s4 }
 0x102   : > { %2222 = dma.done.wait (%p2996_p8), %s534_s5, 2048  }
 0x103   : > { %2224 = vsyncadd (%p2996_p8), %s534_s5, 4294965248  ;;  %s2997_s8 = sld [smem:[#allocation24_spill]]  ;;  %s2998_s12 = sld [smem:[#allocation33_spill]] }
 0x109   : > { %s544_s0 = sand.u32 1, %s2997_s8   ;;  %p2999_p11 = scmp.ne.s32.totalorder %s2998_s12, 0 }
 0x10a   : > { %s1587_s22 = sshll.u32 %s544_s0, 7 }
 0x10b   : > { %s2758_s10 = scalar_lea.vmem [#allocation11], %s1587_s22 }
 0x10c   : > { %2226 = dma.done.wait (%p2999_p11), %s534_s5, 2048  }
 0x10d   : > { %2228 = vsyncadd (%p2999_p11), %s534_s5, 4294965248  ;;  %s2764_s16 = sshll.u32 %s544_s0, 1  ;;  %s552_s3 = scalar_lea.sflag [#allocation13], %s533_s29 }
 0x10e   : > { %s555_s24 = scalar_lea.vmem [#allocation12], %s2764_s16 }
 0x10f   : > { %2230 = dma.done.wait (%p2999_p11), %s552_s3, 2080  }
 0x110   : > { %2232 = vsyncadd (%p2999_p11), %s552_s3, 4294965216  ;;  %s2771_s25 = scalar_lea.vmem [#allocation14], %s1587_s22  ;;  %p3000_p0 = scmp.eq.s32.totalorder %s2492_s23, 0 }
 0x112   : > { %2234 = dma.done.wait (%p3000_p0), [#allocation16], 1024   ;;  %p3001_p10 = pmov %p3000_p0 }
 0x113   : > { %s3002_s14 = sld [smem:[#allocation28_spill]]  ;;  %s3003_s20 = sld [smem:[#allocation39_spill]] }
 0x114   : > { %2236 = vsyncadd (%p3001_p10), [#allocation16], 4294966272 }
 0x119   : > { %s1591_s6 = sadd.s32 4294967292, %s3002_s14  ;;  %p1594_p9 = scmp.ne.s32.totalorder %s3002_s14, 0 }
 0x11a   : > { %p651_p12 = scmp.gt.s32.totalorder %s1591_s6, 0  ;;  %v2300_v0 = vmov (!%p1594_p9), 0.0  }
 0x11b   : > { %671 = vst [vmem:[#allocation2] sm:$0xff] (!%p1594_p9), %v2300_v0  ;;  %672 = vst [vmem:[#allocation4] sm:$0xff] (!%p1594_p9), %v2300_v0 }
 0x11c   : > { %s3035_s6 = smov (!%p651_p12, %s1591_s6), 0  ;;  %670 = sbr.rel (%p1594_p9) target bundleno = 291 (0x123), region = 84 }
 0x11d   : > { %s1592_s30 = sshll.u32 %s3035_s6, 1 }
 0x11e   : > { %p654_p6 = scmp.lt.s32.totalorder %s1592_s30, 7 }
 0x120   : > { %s3037_s30 = smov (!%p654_p6, %s1592_s30), 7 }
 0x121   : > { %s1593_s19 = sshll.u32 %s3037_s30, 1 }
 0x122   : > { %s2781_s29 = scalar_lea.vmem %s3003_s20, %s1593_s19 }
 0x123 PF: > { %s3004_s2 = sld [smem:[#allocation28_spill]] }
 0x129   : > { %p1595_p2 = scmp.ge.s32.totalorder %s3004_s2, 4 }
 0x12a   : > { %v1891_v1 = vld [vmem:[%s2751_s13 + $0x40] sm:$0xff] (!%p1595_p2)   ;;  %v1893_v3 = vld [vmem:[%s2751_s13 + $0x48] sm:$0xff] (!%p1595_p2)   ;;  %v1895_v5 = vld [vmem:[%s2751_s13 + $0x50] sm:$0xff] (!%p1595_p2)  }
 0x12b   : > { %676 = sbr.rel (%p1595_p2) target bundleno = 549 (0x225), region = 88  ;;  %v1892_v2 = vld [vmem:[%s2751_s13] sm:$0xff] (!%p1595_p2)   ;;  %1668 = vmatprep.subr.bf16.mxu0 (!%p1595_p2), %v1891_v1  ;;  %v1894_v4 = vld [vmem:[%s2751_s13 + $0x8] sm:$0xff] (!%p1595_p2)   ;;  %v1896_v6 = vld [vmem:[%s2751_s13 + $0x10] sm:$0xff] (!%p1595_p2)  }
 0x12c   : > { %1669 = vmatpush3.bf16.msra.mxu0 (!%p1595_p2), %v1892_v2  ;;  %v1897_v7 = vld [vmem:[%s2751_s13 + $0x58] sm:$0xff] (!%p1595_p2)   ;;  %v1899_v9 = vld [vmem:[%s2751_s13 + $0x60] sm:$0xff] (!%p1595_p2)   ;;  %v1901_v11 = vld [vmem:[%s2751_s13 + $0x68] sm:$0xff] (!%p1595_p2)  }
 0x12d   : > { %1670 = vmatprep.subr.bf16.mxu0 (!%p1595_p2), %v1893_v3  ;;  %v1898_v8 = vld [vmem:[%s2751_s13 + $0x18] sm:$0xff] (!%p1595_p2)   ;;  %v1900_v10 = vld [vmem:[%s2751_s13 + $0x20] sm:$0xff] (!%p1595_p2)   ;;  %v1902_v14 = vld [vmem:[%s2751_s13 + $0x28] sm:$0xff] (!%p1595_p2)  }
 0x12e   : > { %v678_v12 = vld [vmem:[%s528_s27] sm:$0xff] (!%p1595_p2) }
 0x12f   : > { %v1597_v13 = vcombine.high (!%p1595_p2), %v678_v12, %v678_v12  ;;  %v1903_v15 = vld [vmem:[%s2751_s13 + $0x70] sm:$0xff] (!%p1595_p2)   ;;  %v1905_v17 = vld [vmem:[%s2751_s13 + $0x78] sm:$0xff] (!%p1595_p2)   ;;  %v1596_v19 = vcombine.low (!%p1595_p2), %v678_v12, %v678_v12 }
 0x130   : > { %1671 = vmatpush3.bf16.msra.mxu0 (!%p1595_p2), %v1894_v4  ;;  %v1904_v16 = vld [vmem:[%s2751_s13 + $0x30] sm:$0xff] (!%p1595_p2)   ;;  %v1906_v18 = vld [vmem:[%s2751_s13 + $0x38] sm:$0xff] (!%p1595_p2)  }
 0x131   : > { %1672 = vmatprep.subr.bf16.mxu0 (!%p1595_p2), %v1895_v5  ;;  %846 = vmatprep.mubr.bf16.mxu0 (!%p1595_p2), %v1597_v13  ;;  %v677_v21 = vld [vmem:[#allocation2] sm:$0xff] (!%p1595_p2) }
 0x134   : > { %1673 = vmatpush3.bf16.msra.mxu0 %v1896_v6 }
 0x135   : > { %1674 = vmatprep.subr.bf16.mxu0 %v1897_v7 }
 0x138   : > { %1675 = vmatpush3.bf16.msra.mxu0 %v1898_v8 }
 0x139   : > { %1676 = vmatprep.subr.bf16.mxu0 %v1899_v9 }
 0x13c   : > { %1677 = vmatpush3.bf16.msra.mxu0 %v1900_v10 }
 0x13d   : > { %1678 = vmatprep.subr.bf16.mxu0 %v1901_v11 }
 0x140   : > { %1679 = vmatpush3.bf16.msra.mxu0 %v1902_v14 }
 0x141   : > { %1680 = vmatprep.subr.bf16.mxu0 %v1903_v15 }
 0x144   : > { %1681 = vmatpush3.bf16.msra.mxu0 %v1904_v16 }
 0x145   : > { %1682 = vmatprep.subr.bf16.mxu0 %v1905_v17 }
 0x148   : > { %1683 = vmatpush3.bf16.msra.mxu0 %v1906_v18 }
 0x14b   : > { %847 = vmatmul.mubr.bf16.vlgmr.msra.gmra.mrb[0].mxu0 %v1596_v19 }
 0x21e   : > { %v1684_v20 = vpop.f32.mrb[0].mxu0 }
 0x21f   : > { %v1685_v22 = vpop.f32.mrb[1].mxu0 }
 0x220   : > { %v1686_v23 = vadd.f32 %v1685_v22, %v1684_v20  ;;  %v1687_v24 = vpop.f32.mrb[2].mxu0 }
 0x221   : > { %v1688_v25 = vpop.f32.mrb[3].mxu0 }
 0x222   : > { %v854_v26 = vadd.f32 %v1686_v23, %v677_v21 }
 0x224   : > { %855 = vst [vmem:[#allocation2] sm:$0xff] %v854_v26 }
 0x225 PF: > { %s3005_s4 = sld [smem:[#allocation28_spill]] }
 0x22b   : > { %p1614_p13 = scmp.ne.s32.totalorder %s3005_s4, 4 }
 0x22c   : > { %v860_v27 = vld [vmem:[#allocation2] sm:$0xff] (!%p1614_p13)  ;;  %s3006_s13 = sld [smem:[#allocation36_spill]] (!%p1614_p13) }
 0x22d   : > { %859 = sbr.rel (%p1614_p13) target bundleno = 595 (0x253), region = 92 }
 0x232   : > { %v1615_v28 = vld [vmem:[%s3006_s13] ss:$0 sm:$0xff] (!%p1614_p13) }
 0x233   : > { %v868_v29 = vadd.f32 (!%p1614_p13), %v1615_v28, %v860_v27 }
 0x235   : > { %v869_v30 = vmul.f32 %v868_v29, %v868_v29 }
 0x237   : > { %v870_v31 = vmul.f32 %v869_v30, %v868_v29 }
 0x239   : > { %v871_v32 = vmul.f32 0.044715, %v870_v31 }
 0x23b   : > { %v872_v33 = vadd.f32 %v871_v32, %v868_v29 }
 0x23d   : > { %v873_v34 = vmul.f32 0.7978846, %v872_v33 }
 0x23f   : > { %1909 = vtanh.f32 %v873_v34 }
 0x249   : > { %v1910_v35 = vpop.eup %1909 }
 0x24a   : > { %v875_v36 = vadd.f32 1.0, %v1910_v35 }
 0x24c   : > { %v876_v37 = vmul.f32 0.5, %v875_v36 }
 0x24e   : > { %v877_v38 = vmul.f32 %v876_v37, %v868_v29 }
 0x250   : > { %v878_v39 = vpack.c.bf16 %v877_v38, %v877_v38 }
 0x252   : > { %879 = vst [vmem:[#allocation3] sm:$0xf] %v878_v39 }
 0x253 PF: > { %s3007_s12 = sld [smem:[#allocation28_spill]] }
 0x259   : > { %p1616_p4 = scmp.lt.s32.totalorder %s3007_s12, 4 }
 0x25a   : > { %v1911_v40 = vld [vmem:[%s2758_s10 + $0x4] ss:$8 sps:$4 sm:$0xff] (!%p1616_p4)   ;;  %v1913_v41 = vld [vmem:[%s2758_s10] ss:$8 sps:$4 sm:$0xff] (!%p1616_p4)   ;;  %v2301_v42 = vmov (!%p1616_p4), 0   ;;  %v1939_v62 = vld [vmem:[%s2771_s25 + $0x50] sm:$0xff] (!%p1616_p4)   ;;  %v906_v10 = vlaneseq (!%p1616_p4) }
 0x25b   : > { %883 = sbr.rel (%p1616_p4) target bundleno = 1090 (0x442), region = 96  ;;  %1028 = vmatprep.mubr.bf16.mxu0 (!%p1616_p4), %v2301_v42  ;;  %996 = vmatprep.subr.bf16.mxu0 (!%p1616_p4), %v1911_v40  ;;  %v1914_v43 = vld [vmem:[%s2758_s10 + $0x14] ss:$8 sps:$4 sm:$0xff] (!%p1616_p4)   ;;  %v1916_v44 = vld [vmem:[%s2758_s10 + $0x10] ss:$8 sps:$4 sm:$0xff] (!%p1616_p4)   ;;  %v1935_v50 = vld [vmem:[%s2771_s25 + $0x40] sm:$0xff] (!%p1616_p4)  }
 0x25c   : > { %997 = vmatpush1.bf16.msra.mxu0 (!%p1616_p4), %v1913_v41  ;;  %v1917_v45 = vld [vmem:[%s2758_s10 + $0x24] ss:$8 sps:$4 sm:$0xff] (!%p1616_p4)   ;;  %v1919_v46 = vld [vmem:[%s2758_s10 + $0x20] ss:$8 sps:$4 sm:$0xff] (!%p1616_p4)   ;;  %v1920_v47 = vld [vmem:[%s2758_s10 + $0x34] ss:$8 sps:$4 sm:$0xff] (!%p1616_p4)   ;;  %1690 = vmatprep.subr.bf16.mxu1 (!%p1616_p4), %v1935_v50 }
 0x25d   : > { %998 = vmatprep.subr.bf16.mxu0 (!%p1616_p4), %v1914_v43  ;;  %v1922_v48 = vld [vmem:[%s2758_s10 + $0x30] ss:$8 sps:$4 sm:$0xff] (!%p1616_p4)   ;;  %v1923_v49 = vld [vmem:[%s2758_s10 + $0x44] ss:$8 sps:$4 sm:$0xff] (!%p1616_p4)   ;;  %v1925_v52 = vld [vmem:[%s2758_s10 + $0x40] ss:$8 sps:$4 sm:$0xff] (!%p1616_p4)  }
 0x25e   : > { %v1936_v51 = vld [vmem:[%s2771_s25] sm:$0xff] (!%p1616_p4)   ;;  %v1937_v53 = vld [vmem:[%s2771_s25 + $0x48] sm:$0xff] (!%p1616_p4)   ;;  %v1926_v55 = vld [vmem:[%s2758_s10 + $0x54] ss:$8 sps:$4 sm:$0xff] (!%p1616_p4)   ;;  %v907_v11 = vshrl.u32 (!%p1616_p4), %v906_v10, 7  ;;  %s1039_s0 = sld [smem:[#allocation5]] (!%p1616_p4) }
 0x25f   : > { %1691 = vmatpush3.bf16.msra.mxu1 (!%p1616_p4), %v1936_v51  ;;  %v1938_v54 = vld [vmem:[%s2771_s25 + $0x8] sm:$0xff] (!%p1616_p4)   ;;  %v1931_v58 = vld [vmem:[%s2758_s10 + $0x60] ss:$8 sps:$4 sm:$0xff] (!%p1616_p4)   ;;  %v1932_v59 = vld [vmem:[%s2758_s10 + $0x74] ss:$8 sps:$4 sm:$0xff] (!%p1616_p4)  }
 0x260   : > { %999 = vmatpush1.bf16.msra.mxu0 (!%p1616_p4), %v1916_v44  ;;  %1692 = vmatprep.subr.bf16.mxu1 (!%p1616_p4), %v1937_v53  ;;  %v1928_v56 = vld [vmem:[%s2758_s10 + $0x50] ss:$8 sps:$4 sm:$0xff] (!%p1616_p4)   ;;  %v1929_v57 = vld [vmem:[%s2758_s10 + $0x64] ss:$8 sps:$4 sm:$0xff] (!%p1616_p4)   ;;  %v1941_v0 = vld [vmem:[%s2771_s25 + $0x58] sm:$0xff] (!%p1616_p4)   ;;  %v908_v12 = vsub.s32 (!%p1616_p4), 0, %v907_v11 }
 0x261   : > { %1000 = vmatprep.subr.bf16.mxu0 (!%p1616_p4), %v1917_v45  ;;  %v1934_v60 = vld [vmem:[%s2758_s10 + $0x70] ss:$8 sps:$4 sm:$0xff] (!%p1616_p4)   ;;  %v887_v61 = vld [vmem:[#allocation3] sm:$0xf] (!%p1616_p4)  ;;  %v1942_v1 = vld [vmem:[%s2771_s25 + $0x18] sm:$0xff] (!%p1616_p4)   ;;  %v912_v14 = vsub.s32 (!%p1616_p4), 1, %v907_v11 }
 0x262   : > { %v1940_v63 = vld [vmem:[%s2771_s25 + $0x10] sm:$0xff]   ;;  %v1943_v2 = vld [vmem:[%s2771_s25 + $0x60] sm:$0xff]   ;;  %v1945_v4 = vld [vmem:[%s2771_s25 + $0x68] sm:$0xff]  }
 0x263   : > { %1693 = vmatpush3.bf16.msra.mxu1 %v1938_v54  ;;  %v1944_v3 = vld [vmem:[%s2771_s25 + $0x20] sm:$0xff]   ;;  %v1946_v5 = vld [vmem:[%s2771_s25 + $0x28] sm:$0xff]   ;;  %v1947_v6 = vld [vmem:[%s2771_s25 + $0x70] sm:$0xff]  }
 0x264   : > { %1001 = vmatpush1.bf16.msra.mxu0 %v1919_v46  ;;  %1694 = vmatprep.subr.bf16.mxu1 %v1939_v62  ;;  %v1948_v7 = vld [vmem:[%s2771_s25 + $0x30] sm:$0xff]   ;;  %v1949_v8 = vld [vmem:[%s2771_s25 + $0x78] sm:$0xff]   ;;  %v1040_v24 = vstv %s1039_s0  ;;  %v1074_v46 = vld [vmem:[#allocation4] sm:$0xff] }
 0x265   : > { %1002 = vmatprep.subr.bf16.mxu0 %v1920_v47  ;;  %v1950_v9 = vld [vmem:[%s2771_s25 + $0x38] sm:$0xff]  }
 0x266   : > { %v904_v13 = vld [vmem:[%s555_s24] sm:$0x3]  ;;  %v884_v23 = vld [vmem:[%s528_s27] sm:$0xff] }
 0x267   : > { %1695 = vmatpush3.bf16.msra.mxu1 %v1940_v63  ;;  %v909_v15 = vrot.slane %v904_v13, %v908_v12  ;;  %v913_v16 = vrot.slane %v904_v13, %v912_v14  ;;  %v1045_v25 = vld [vmem:[%s2781_s29] ss:$2 sm:$0x3]  ;;  %v885_v26 = vunpack.c.l.bf16 %v884_v23  ;;  %v886_v28 = vunpack.c.h.bf16 %v884_v23  ;;  %v1633_v29 = vld [vmem:[%s2781_s29 + $0x1] ss:$2 sm:$0x3] }
 0x268   : > { %1003 = vmatpush1.bf16.msra.mxu0 %v1922_v48  ;;  %1696 = vmatprep.subr.bf16.mxu1 %v1941_v0  ;;  %v1052_v32 = vrot.slane %v1045_v25, %v908_v12  ;;  %v1056_v34 = vrot.slane %v1045_v25, %v912_v14  ;;  %v1065_v35 = vrot.slane %v1633_v29, %v908_v12 }
 0x269   : > { %1004 = vmatprep.subr.bf16.mxu0 %v1923_v49  ;;  %v1069_v38 = vrot.slane %v1633_v29, %v912_v14 }
 0x26b   : > { %1697 = vmatpush3.bf16.msra.mxu1 %v1942_v1 }
 0x26c   : > { %1005 = vmatpush1.bf16.msra.mxu0 %v1925_v52  ;;  %1698 = vmatprep.subr.bf16.mxu1 %v1943_v2 }
 0x26d   : > { %1006 = vmatprep.subr.bf16.mxu0 %v1926_v55 }
 0x26f   : > { %1699 = vmatpush3.bf16.msra.mxu1 %v1944_v3 }
 0x270   : > { %1007 = vmatpush1.bf16.msra.mxu0 %v1928_v56  ;;  %1700 = vmatprep.subr.bf16.mxu1 %v1945_v4 }
 0x271   : > { %1008 = vmatprep.subr.bf16.mxu0 %v1929_v57 }
 0x273   : > { %1701 = vmatpush3.bf16.msra.mxu1 %v1946_v5 }
 0x274   : > { %1009 = vmatpush1.bf16.msra.mxu0 %v1931_v58  ;;  %1702 = vmatprep.subr.bf16.mxu1 %v1947_v6 }
 0x275   : > { %1010 = vmatprep.subr.bf16.mxu0 %v1932_v59 }
 0x277   : > { %1703 = vmatpush3.bf16.msra.mxu1 %v1948_v7 }
 0x278   : > { %1011 = vmatpush1.bf16.msra.mxu0 %v1934_v60  ;;  %1704 = vmatprep.subr.bf16.mxu1 %v1949_v8 }
 0x27b   : > { %1029 = vmatmul.mubr.bf16.vlgmr.msra.gmra.mrb[0].mxu0 %v887_v61  ;;  %1705 = vmatpush3.bf16.msra.mxu1 %v1950_v9 }
 0x34e   : > { %v1030_v17 = vpop.f32.mrb[0].mxu0 }
 0x34f   : > { %v1031_v18 = vadd.f32 %v1030_v17, %v909_v15  ;;  %v1032_v19 = vpop.f32.mrb[1].mxu0 }
 0x350   : > { %v1033_v20 = vadd.f32 %v1032_v19, %v913_v16  ;;  %v1034_v21 = vpop.f32.mrb[2].mxu0 }
 0x351   : > { %1951 = vtanh.f32 %v1031_v18  ;;  %v1035_v22 = vpop.f32.mrb[3].mxu0 }
 0x352   : > { %1953 = vtanh.f32 %v1033_v20 }
 0x35b   : > { %v1952_v27 = vpop.eup %1951 }
 0x35c   : > { %v1954_v30 = vpop.eup %1953  ;;  %v1041_v31 = vmul.f32 %v1952_v27, %v1040_v24 }
 0x35d   : > { %v1042_v33 = vmul.f32 %v1954_v30, %v1040_v24 }
 0x35e   : > { %v1043_v36 = vadd.f32 %v1041_v31, %v885_v26 }
 0x35f   : > { %v1044_v37 = vadd.f32 %v1042_v33, %v886_v28 }
 0x360   : > { %v1059_v39 = vmax.f32 %v1052_v32, %v1043_v36 }
 0x361   : > { %v1060_v40 = vmax.f32 %v1056_v34, %v1044_v37 }
 0x362   : > { %v1072_v41 = vmin.f32 %v1065_v35, %v1059_v39 }
 0x363   : > { %v1073_v42 = vmin.f32 %v1069_v38, %v1060_v40 }
 0x364   : > { %v1075_v44 = vpack.c.bf16 %v1072_v41, %v1072_v41 }
 0x365   : > { %v1076_v43 = vpack.c.bf16 %v1073_v42, %v1073_v42 }
 0x367   : > { %1237 = vmatprep.mubr.bf16.mxu1 %v1076_v43 }
 0x368   : > { %1238 = vmatmul.mubr.bf16.vlgmr.msra.gmra.mrb[0].mxu1 %v1075_v44 }
 0x43b   : > { %v1706_v45 = vpop.f32.mrb[0].mxu1 }
 0x43c   : > { %v1707_v47 = vpop.f32.mrb[1].mxu1 }
 0x43d   : > { %v1708_v48 = vadd.f32 %v1707_v47, %v1706_v45  ;;  %v1709_v49 = vpop.f32.mrb[2].mxu1 }
 0x43e   : > { %v1710_v50 = vpop.f32.mrb[3].mxu1 }
 0x43f   : > { %v1245_v51 = vadd.f32 %v1708_v48, %v1074_v46 }
 0x441   : > { %1246 = vst [vmem:[#allocation4] sm:$0xff] %v1245_v51 }
 0x442 PF: > { %s3008_s9 = sld [smem:[#allocation28_spill]] }
 0x448   : > { %p1650_p5 = scmp.ne.s32.totalorder %s3008_s9, 7 }
 0x449   : > { %v1251_v52 = vld [vmem:[#allocation4] sm:$0xff] (!%p1650_p5)  ;;  %v2302_v54 = vmov (!%p1650_p5), 0.0   ;;  %v1957_v57 = vld [vmem:[#allocation15 + $0x10] sm:$0xff] (!%p1650_p5)   ;;  %v1958_v58 = vld [vmem:[#allocation15 + $0x18] sm:$0xff] (!%p1650_p5)   ;;  %vm2303_vm0 = vmmov (!%p1650_p5), 0  }
 0x44a   : > { %1250 = sbr.rel (%p1650_p5) target bundleno = 1474 (0x5c2), region = 100  ;;  %v1252_v53 = vmul.f32 (!%p1650_p5), %v1251_v52, %v1251_v52  ;;  %1721 = vmatprep.subr.bf16.mxu0 (!%p1650_p5), %v2302_v54  ;;  %v1955_v55 = vld [vmem:[#allocation15] sm:$0xff] (!%p1650_p5)   ;;  %v1956_v56 = vld [vmem:[#allocation15 + $0x8] sm:$0xff] (!%p1650_p5)   ;;  %1737 = vmatprep.mubr.msk.bf16.mxu0 (!%p1650_p5), %vm2303_vm0, %v2302_v54  ;;  %v1961_v61 = vld [vmem:[#allocation15 + $0x30] sm:$0xff] (!%p1650_p5)  }
 0x44b   : > { %1722 = vmatpush3.bf16.msra.mxu0 (!%p1650_p5), %v1955_v55  ;;  %v1959_v59 = vld [vmem:[#allocation15 + $0x20] sm:$0xff] (!%p1650_p5)   ;;  %v1960_v60 = vld [vmem:[#allocation15 + $0x28] sm:$0xff] (!%p1650_p5)   ;;  %v1962_v62 = vld [vmem:[#allocation15 + $0x38] sm:$0xff] (!%p1650_p5)  }
 0x44c   : > { %1253 = vadd.xlane.f32.xlu0 (!%p1650_p5), %v1252_v53  ;;  %1723 = vmatprep.subr.bf16.mxu0 (!%p1650_p5), %v2302_v54 }
 0x44f   : > { %1724 = vmatpush3.bf16.msra.mxu0 (!%p1650_p5), %v1956_v56 }
 0x450   : > { %1725 = vmatprep.subr.bf16.mxu0 (!%p1650_p5), %v2302_v54 }
 0x453   : > { %1726 = vmatpush3.bf16.msra.mxu0 %v1957_v57 }
 0x454   : > { %1727 = vmatprep.subr.bf16.mxu0 %v2302_v54 }
 0x457   : > { %1728 = vmatpush3.bf16.msra.mxu0 %v1958_v58 }
 0x458   : > { %1729 = vmatprep.subr.bf16.mxu0 %v2302_v54 }
 0x45b   : > { %1730 = vmatpush3.bf16.msra.mxu0 %v1959_v59 }
 0x45c   : > { %1731 = vmatprep.subr.bf16.mxu0 %v2302_v54 }
 0x45f   : > { %1732 = vmatpush3.bf16.msra.mxu0 %v1960_v60 }
 0x460   : > { %1733 = vmatprep.subr.bf16.mxu0 %v2302_v54 }
 0x463   : > { %1734 = vmatpush3.bf16.msra.mxu0 %v1961_v61 }
 0x464   : > { %1735 = vmatprep.subr.bf16.mxu0 %v2302_v54 }
 0x467   : > { %1736 = vmatpush3.bf16.msra.mxu0 %v1962_v62 }
 0x4d9   : > { %v1254_v63 = vpop.xlane.xlu0 %1253 }
 0x4da   : > { %v1255_v0 = vadd.f32 1e-12, %v1254_v63 }
 0x4dc   : > { %1963 = vrsqrt.f32 %v1255_v0 }
 0x4e6   : > { %v1964_v1 = vpop.eup %1963 }
 0x4e7   : > { %v1257_v2 = vmul.f32 %v1964_v1, %v1251_v52 }
 0x4e9   : > { %v1258_v3 = vpack.c.bf16 %v1257_v2, %v1257_v2 }
 0x4eb   : > { %1738 = vmatmul.mubr.bf16.vlgmr.msra.gmra.mrb[0].mxu0 %v1258_v3 }
 0x5be   : > { %v1357_v4 = vpop.f32.mrb[0].mxu0 }
 0x5bf   : > { %1363 = vst [vmem:[#allocation17] sm:$0xff] %v1357_v4  ;;  %v1739_v5 = vpop.f32.mrb[1].mxu0 }
 0x5c0   : > { %v1360_v6 = vpop.f32.mrb[2].mxu0 }
 0x5c1   : > { %v1740_v7 = vpop.f32.mrb[3].mxu0 }
 0x5c2 PF: > { %p1782_p3 = scmp.eq.s32.totalorder %s2492_s23, 7  ;;  %s2304_s27 = smov [#allocation17]  }
 0x5c3   : > { %s1373_s22 = sshll.u32 %s2304_s27, 4  ;;  %s1374_s22 = int_to_ptr.vmem [resolvable:$true] %s1373_s22 }
 0x5c4   : > { %s2143_s10 = scalar_lea.vmem %s1374_s22, 128  ;;  %p2150_p11 = scmp.lt.s32.totalorder %s1374_s22, %s1374_s22 }
 0x5c5   : > { %p2144_p1 = scmp.ne.s32.totalorder %s1374_s22, %s2143_s10  ;;  %p2151_p0 = scmp.lt.s32.totalorder %s2143_s10, %s2143_s10 }
 0x5c7   : > { %p2145_p7 = pnand %p2144_p1, %p1782_p3  ;;  %p2152_p10 = por %p2151_p0, %p2150_p11 }
 0x5c9   : > { %p2146_p8 = pneg %p2145_p7 }
 0x5cb   : > { %p2153_p12 = pnand %p2152_p10, %p2146_p8 }
 0x5cd   : > { %2156 = shalt.err (!%p2153_p12)
}
 0x5ce   : > { %s3009_s24 = sld [smem:[#allocation42_spill]] }
 0x5d4   : > { %s2157_s25 = scalar_lea.hbm %s3009_s24, 128 }
 0x5d5   : > { %p2158_p6 = scmp.ne.s32.totalorder %s3009_s24, %s2157_s25  ;;  %p2163_p13 = scmp.lt.u32.totalorder %s2157_s25, %s3009_s24 }
 0x5d7   : > { %p2159_p9 = pnand %p2158_p6, %p1782_p3 }
 0x5d9   : > { %p2160_p2 = pneg %p2159_p9 }
 0x5db   : > { %p2165_p4 = pnand %p2163_p13, %p2160_p2 }
 0x5dd   : > { %2168 = shalt.err (!%p2165_p4)
}
 0x5de   : > { %1756 = dma.vmem_to_hbm [thread:$0]  (%p1782_p3), %s1374_s22, 128, %s3009_s24, [#allocation8]  }
 0x5df   : > { %2238 = dma.done.wait (%p1782_p3), [#allocation8], 128  }
 0x5e0   : > { %2240 = vsyncadd (%p1782_p3), [#allocation8], 4294967168 }
 0x5e1 PF: > { %s31_s21 = sadd.s32 1, %s2287_s21   ;;  %s3010_s20 = sld [smem:[#allocation24_spill]] }
 0x5e2   : > { %p28_p5 = scmp.ge.s32.totalorder %s31_s21, 10   ;;  %s3011_s12 = sld [smem:[#allocation25_spill]] }
 0x5e3   : > { %s3012_s13 = sld [smem:[#allocation34_spill]]  ;;  %s3013_s14 = sld [smem:[#allocation26_spill]] }
 0x5e4   : > { %s3014_s15 = sld [smem:[#allocation27_spill]]  ;;  %s3015_s16 = sld [smem:[#allocation31_spill]] }
 0x5e5   : > { %s3016_s29 = smov %s2649_s11  ;;  %s3017_s19 = sld [smem:[#allocation29_spill]] }
 0x5e6   : > { %s3018_s2 = sld [smem:[#allocation30_spill]]  ;;  %s3020_s0 = smov %s2271_s17 }
 0x5e7   : > { %s3019_s11 = smov %s3010_s20  ;;  %s3021_s17 = smov %s2275_s18 }
 0x5e8   : > { %s3022_s18 = smov %s3016_s29  ;;  %30 = sbr.rel (!%p28_p5) target bundleno = 23 (0x17), region = 170 }
 0x5ec   : > { %s3023_s20 = smov %s3018_s2 }
 0x5ef   :  { %1386 = vsyncpa [#allocation7], 1 }
 0x5f0   :  { %1388 = vsyncpa [#allocation7 + $0x1], 1 }
 0x5f1   :  { %1389 = vsyncpa [#allocation10], 1 }
 0x5f2   :  { %1391 = vsyncpa [#allocation10 + $0x1], 1 }
 0x5f3   :  { %1392 = vsyncpa [#allocation13], 1 }
 0x5f4   :  { %1394 = vsyncpa [#allocation13 + $0x1], 1 }
 0x5f5   :  { %1395 = vsyncpa [#allocation16], 1 }
 0x5f6   :  { %1396 = vsyncpa [#allocation8], 1 }
 0x5f7   :  { %1398 = vsyncpa [#allocation8 + $0x1], 1 }

</bundles_post_ra>
